<compile_context>
chip_gen: v7x
topology: tpu7x:2x2x1
jax: 0.10.0
libtpu: 0.0.40
codegen_flags: <defaults>
</compile_context>

<pallas_src>
import math

import jax
import jax.numpy as jnp
from jax import lax
from jax.experimental import pallas as pl
from jax.experimental.pallas import tpu as pltpu

# ----------------------------- synthetic config -----------------------------
VOCAB_SIZE   = 100
MAX_LENGTH   = 8            # stands in for 77 (pad 77 -> 80 at real scale)
HIDDEN       = 128          # stands in for 768; lane-dense (multiple of 128)
NUM_HEADS    = 2            # stands in for 12 (HEAD_DIM = 64 here and at real scale)
HEAD_DIM     = HIDDEN // NUM_HEADS
FFN          = 4 * HIDDEN   # CLIP uses 4x expansion
NUM_LAYERS   = 2            # stands in for 12
LAYER_IDX    = -1           # module default
PAD_TOKEN_ID = 0
LN_EPS       = 1e-5
ATTN_SCALE   = HEAD_DIM ** -0.5

# MLP computed in FFN_CHUNKS column chunks (fc2 partials accumulated into the
# [m, D] residual) so the live f32 intermediate stays small at large nt.
FFN_CHUNKS = 2
assert FFN % FFN_CHUNKS == 0 and (FFN // FFN_CHUNKS) % 128 == 0

assert 1 <= abs(LAYER_IDX) <= NUM_LAYERS
# hidden_states[-k] is the output of layer (L - k + 1); final_layer_norm is
# applied on top of it -> run the first (L - |layer_idx| + 1) layers.
ACTIVE_LAYERS = NUM_LAYERS - (abs(LAYER_IDX) - 1)

# Packed layout of the small per-layer f32 params (all widths are multiples
# of 128 both here and at real CLIP dims -> static lane-aligned slices).
_PACK_FIELDS = (
    ('bqkv',  3 * HIDDEN),
    ('o_b',   HIDDEN),
    ('fc1_b', FFN),
    ('fc2_b', HIDDEN),
    ('ln1_w', HIDDEN),
    ('ln1_b', HIDDEN),
    ('ln2_w', HIDDEN),
    ('ln2_b', HIDDEN),
)
PACK_LAYOUT = {}
_off = 0
for _name, _width in _PACK_FIELDS:
    PACK_LAYOUT[_name] = (_off, _width)
    _off += _width
PACK_WIDTH = _off
assert PACK_WIDTH % 128 == 0


# ------------------------------ tiling planner ------------------------------
def _num_tensorcores():
    """Best-effort TensorCores-per-chip (v7x: 2; v5e/v6e: 1)."""
    try:
        return max(1, int(getattr(jax.devices()[0], 'num_cores', 1)))
    except Exception:
        return 1


def _vmem_limit_bytes():
    """Per-generation VMEM budget: ~85% of physical VMEM (128 MiB on v5e/v6e,
    64 MiB on v7x), capped to leave headroom for compiler temporaries."""
    try:
        cap = int(pltpu.get_tpu_info().vmem_capacity_bytes)
    except Exception:
        cap = 64 * 1024 * 1024            # conservative fallback: v7x physical VMEM
    return min(int(cap * 0.85), 110 * 1024 * 1024)


def _pick_n_tile(n, t, d, f, budget_bytes, num_cores):
    """Largest divisor tile nt of the chunks*batch axis whose per-step working
    set fits the VMEM budget.  Bigger nt -> m = nt*t matmul rows large enough
    to feed the MXU (>= 256-512 rows at real CLIP dims) and the per-layer
    weights re-streamed from HBM as few times as possible (once if n//nt==1).
    On multi-TC chips (v7x) keep >= num_cores outer tiles for core sharding.
    """
    w_bytes = 2 * 2 * d * (3 * d + d + 2 * f)        # double-buffered bf16 weights
    w_bytes += 2 * 4 * PACK_WIDTH + 4 * 2 * d        # packed params + final LN
    cap_nt = max(1, n // num_cores) if num_cores > 1 else n
    best = 1
    for nt in range(1, min(n, cap_nt) + 1):
        if n % nt:
            continue
        m = nt * t
        act = 4 * m * d * 3                          # resident out block + 2x x block
        qkv = 4 * m * 3 * d                          # transient fused qkv
        mlp = 6 * m * (f // FFN_CHUNKS)              # f32 MLP chunk + bf16 cast
        attn = 4 * NUM_HEADS * nt * t * t            # score / prob tiles
        if w_bytes + act + qkv + mlp + attn + (2 << 20) <= budget_bytes:
            best = nt
    return best


# --------------------------- shared transformer math ------------------------
def _layer_norm(x, w, b):
    mu = jnp.mean(x, axis=-1, keepdims=True)
    xc = x - mu
    var = jnp.mean(xc * xc, axis=-1, keepdims=True)
    return xc * lax.rsqrt(var + LN_EPS) * w + b


def _causal_mask(t):
    row = lax.broadcasted_iota(jnp.int32, (t, t), 0)
    col = lax.broadcasted_iota(jnp.int32, (t, t), 1)
    return jnp.where(col <= row, 0.0, -1e9).astype(jnp.float32)


def _unpack(pk):
    """pk: [PACK_WIDTH] f32 -> dict of 1-D per-layer params (static slices)."""
    return {name: pk[off:off + width] for name, (off, width) in PACK_LAYOUT.items()}


def _clip_layer(x, causal, wqkv, o_w, fc1_w, fc2_w, pp, recip):
    """One pre-LN CLIP text-encoder layer.  x: [n, T, D] f32 -> [n, T, D] f32.

    wqkv is head-major ([h: q|k|v] columns) with ATTN_SCALE pre-folded into
    the q columns, so heads fold into the attention batch axis with a single
    concat and a single unfold.  Weight matmuls are flat 2-D bf16 MXU dots
    with f32 accumulation; LN / softmax / residuals in f32.  The MLP runs in
    FFN_CHUNKS column chunks accumulating fc2 partials.
    """
    n, t, d = x.shape
    m = n * t
    nh, hd = NUM_HEADS, HEAD_DIM

    # ---- self attention ----
    h = _layer_norm(x, pp['ln1_w'], pp['ln1_b'])
    qkv = jnp.dot(h.reshape(m, d).astype(wqkv.dtype), wqkv,
                  preferred_element_type=jnp.float32) + pp['bqkv']    # [m, 3D]
    qkv = qkv.reshape(n, t, 3 * d)

    # heads -> batch: single concat over head-major column blocks (3*hd each)
    qkvh = jnp.concatenate(
        [qkv[:, :, h_ * 3 * hd:(h_ + 1) * 3 * hd] for h_ in range(nh)], axis=0)
    q = qkvh[:, :, 0:hd]              # ATTN_SCALE already folded into wqkv/bqkv
    k = qkvh[:, :, hd:2 * hd]
    v = qkvh[:, :, 2 * hd:3 * hd]

    s = jnp.einsum('bqd,bkd->bqk', q, k,
                   preferred_element_type=jnp.float32) + causal[None]
    p = jnp.exp(s - jnp.max(s, axis=-1, keepdims=True))
    p = p * recip(jnp.sum(p, axis=-1, keepdims=True))
    ctx = jnp.einsum('bqk,bkd->bqd', p, v,
                     preferred_element_type=jnp.float32)              # [nh*n,t,hd]
    ctx = jnp.concatenate([ctx[h_ * n:(h_ + 1) * n] for h_ in range(nh)], axis=-1)

    attn = jnp.dot(ctx.reshape(m, d).astype(o_w.dtype), o_w,
                   preferred_element_type=jnp.float32) + pp['o_b']
    x = x + attn.reshape(n, t, d)

    # ---- MLP (quick_gelu), chunked over the FFN axis ----
    h2 = _layer_norm(x, pp['ln2_w'], pp['ln2_b']).reshape(m, d)
    fc = FFN // FFN_CHUNKS
    ff_out = jnp.zeros((m, d), jnp.float32)
    for c in range(FFN_CHUNKS):
        lo = c * fc
        ffc = jnp.dot(h2.astype(fc1_w.dtype), fc1_w[:, lo:lo + fc],
                      preferred_element_type=jnp.float32) + pp['fc1_b'][lo:lo + fc]
        ffc = ffc * jax.nn.sigmoid(1.702 * ffc)
        ff_out = ff_out + jnp.dot(ffc.astype(fc2_w.dtype), fc2_w[lo:lo + fc, :],
                                  preferred_element_type=jnp.float32)
    ff_out = ff_out + pp['fc2_b']
    return x + ff_out.reshape(n, t, d)


# --------------------------------- kernel -----------------------------------
def clip_layer_kernel(x_ref, wqkv_ref, ow_ref, fc1w_ref, fc2w_ref,
                      pack_ref, fln_ref, out_ref, mask_ref):
    """grid = (n_tiles, ACTIVE_LAYERS): one encoder layer of one tile.

    The output block index is constant along the layer axis, so out_ref is the
    VMEM-resident layer carry: seeded with the embedded tokens at l == 0 and
    layer-normed in place at l == last (no separate accumulator scratch).
    """
    l = pl.program_id(1)
    last = pl.num_programs(1) - 1

    @pl.when(l == 0)
    def _init():
        out_ref[...] = x_ref[...]
        mask_ref[...] = _causal_mask(mask_ref.shape[0])   # built once per tile

    pp = _unpack(pack_ref[0, 0])                          # [PACK_WIDTH] f32 params

    y = _clip_layer(out_ref[...], mask_ref[...],
                    wqkv_ref[0], ow_ref[0], fc1w_ref[0], fc2w_ref[0], pp,
                    recip=lambda z: pl.reciprocal(z, approx=True))

    @pl.when(l < last)
    def _carry():
        out_ref[...] = y

    @pl.when(l == last)
    def _finalize():
        out_ref[...] = _layer_norm(y, fln_ref[0], fln_ref[1]).astype(out_ref.dtype)


def run_encoder_pallas(x, w):
    """x: [N, T, D] f32 embedded tokens -> [N, T, D] f32 encoder output."""
    n, t_in, d = x.shape
    f = FFN

    # Pad T to an f32 sublane multiple of 8 (real CLIP: 77 -> 80).  Padded key
    # columns are masked by the causal mask for every real query row; padded
    # query rows are sliced off below.
    t = -(-t_in // 8) * 8
    if t != t_in:
        x = jnp.pad(x, ((0, 0), (0, t - t_in), (0, 0)))

    vmem_limit = _vmem_limit_bytes()
    nt = _pick_n_tile(n, t, d, f, budget_bytes=int(vmem_limit * 0.9),
                      num_cores=_num_tensorcores())
    grid = (n // nt, ACTIVE_LAYERS)

    xmap = lambda i, l: (i, 0, 0)          # activation tile: depends on i only
    wmap = lambda i, l: (l, 0, 0)          # per-layer weight streaming
    fmap = lambda i, l: (0, 0)             # final layer norm params (resident)

    in_specs = [
        pl.BlockSpec((nt, t, d), xmap),            # embedded tokens
        pl.BlockSpec((1, d, 3 * d), wmap),         # wqkv (bf16, head-major, q pre-scaled)
        pl.BlockSpec((1, d, d), wmap),             # o_w   (bf16)
        pl.BlockSpec((1, d, f), wmap),             # fc1_w (bf16)
        pl.BlockSpec((1, f, d), wmap),             # fc2_w (bf16)
        pl.BlockSpec((1, 1, PACK_WIDTH), wmap),    # packed small f32 per-layer params
        pl.BlockSpec((2, d), fmap),                # final layer norm [w; b]
    ]
    out_specs = pl.BlockSpec((nt, t, d), xmap)

    # Advisory cost estimate so XLA schedules the surrounding embed/concat.
    m_total = n * t
    proj_flops = 2 * m_total * d * (3 * d + d + 2 * f)
    attn_flops = 4 * n * NUM_HEADS * t * t * HEAD_DIM
    flops = int(ACTIVE_LAYERS * (proj_flops + attn_flops))
    transcendentals = int(ACTIVE_LAYERS * (n * NUM_HEADS * t * t
                                           + m_total * f + 4 * m_total))
    w_bytes_layer = 2 * d * (3 * d + d + 2 * f) + 4 * PACK_WIDTH
    bytes_accessed = int((n // nt) * ACTIVE_LAYERS * w_bytes_layer
                         + 3 * 4 * m_total * d)

    out = pl.pallas_call(
        clip_layer_kernel,
        out_shape=jax.ShapeDtypeStruct((n, t, d), jnp.float32),
        grid_spec=pltpu.PrefetchScalarGridSpec(
            num_scalar_prefetch=0,
            grid=grid,
            in_specs=in_specs,
            out_specs=out_specs,
            scratch_shapes=[pltpu.VMEM((t, t), jnp.float32)],   # hoisted causal mask
        ),
        compiler_params=pltpu.CompilerParams(
            dimension_semantics=("parallel", "arbitrary"),
            vmem_limit_bytes=vmem_limit,
        ),
        cost_estimate=pl.CostEstimate(flops=flops,
                                      transcendentals=transcendentals,
                                      bytes_accessed=bytes_accessed),
        # NOTE: if xprof shows exposed layer-boundary weight DMA (v5e/v6e with
        # n//nt == 1), bump the big weight BlockSpecs to pipeline_mode=
        # pl.Buffered(3).
    )(x, w['wqkv'], w['o_w'], w['fc1_w'], w['fc2_w'], w['pack'], w['fln'])

    return out[:, :t_in, :]


# ------------------------- pure-JAX reference (same math) -------------------
def encoder_reference(x, w):
    # NOTE: consumes the same bf16-cast weights as the kernel, so it validates
    # the Pallas path against XLA on identical math (not against an f32
    # checkpoint).
    causal = _causal_mask(x.shape[1])
    recip = lambda z: 1.0 / z
    for l in range(ACTIVE_LAYERS):
        pp = _unpack(w['pack'][l, 0])
        x = _clip_layer(x, causal, w['wqkv'][l], w['o_w'][l],
                        w['fc1_w'][l], w['fc2_w'][l], pp, recip)
    return _layer_norm(x, w['fln'][0], w['fln'][1])


# ------------------------------ full forward --------------------------------
def frozen_clip_forward(tokens, w, *, use_pallas=True):
    """tokens: [B, T_total] int32 -> [B, num_chunks * MAX_LENGTH, HIDDEN]."""
    b, t_total = tokens.shape
    chunks = math.ceil((t_total - 2) / (MAX_LENGTH - 2))

    chunk_tok = []
    for i in range(chunks):
        tc = tokens[:, i * (MAX_LENGTH - 2):(i + 1) * (MAX_LENGTH - 2) + 2]
        if tc.shape[1] < MAX_LENGTH:
            pad = jnp.full((b, MAX_LENGTH - tc.shape[1]), PAD_TOKEN_ID,
                           dtype=tokens.dtype)
            tc = jnp.concatenate([tc, pad], axis=1)
        tc = tc.at[:, 0].set(tokens[:, 0])
        tc = tc.at[:, -1].set(tokens[:, -1])
        chunk_tok.append(tc)

    tok_all = jnp.concatenate(chunk_tok, axis=0)                  # [chunks*B, T]
    # token + position embedding (gather is glue; stays in plain JAX/XLA)
    x = (w['tok_emb'][tok_all] + w['pos_emb'][None]).astype(jnp.float32)

    z_all = run_encoder_pallas(x, w) if use_pallas else encoder_reference(x, w)

    z_chunks = jnp.split(z_all, chunks, axis=0)                   # chunks x [B,T,D]
    return jnp.concatenate(z_chunks, axis=1)                      # [B, chunks*T, D]


# ------------------------------- param init ---------------------------------
def init_params(key):
    ks = jax.random.split(key, 16)
    L, D, F = NUM_LAYERS, HIDDEN, FFN
    s = 0.02
    return {
        'tok_emb': jax.random.normal(ks[0], (VOCAB_SIZE, D), jnp.float32) * s,
        'pos_emb': jax.random.normal(ks[1], (MAX_LENGTH, D), jnp.float32) * s,
        'ln1_w': jnp.ones((L, D), jnp.float32),
        'ln1_b': jnp.zeros((L, D), jnp.float32),
        'q_w': jax.random.normal(ks[2], (L, D, D), jnp.float32) * s,
        'q_b': jax.random.normal(ks[3], (L, D), jnp.float32) * s,
        'k_w': jax.random.normal(ks[4], (L, D, D), jnp.float32) * s,
        'k_b': jax.random.normal(ks[5], (L, D), jnp.float32) * s,
        'v_w': jax.random.normal(ks[6], (L, D, D), jnp.float32) * s,
        'v_b': jax.random.normal(ks[7], (L, D), jnp.float32) * s,
        'o_w': jax.random.normal(ks[8], (L, D, D), jnp.float32) * s,
        'o_b': jax.random.normal(ks[9], (L, D), jnp.float32) * s,
        'ln2_w': jnp.ones((L, D), jnp.float32),
        'ln2_b': jnp.zeros((L, D), jnp.float32),
        'fc1_w': jax.random.normal(ks[10], (L, D, F), jnp.float32) * s,
        'fc1_b': jax.random.normal(ks[11], (L, F), jnp.float32) * s,
        'fc2_w': jax.random.normal(ks[12], (L, F, D), jnp.float32) * s,
        'fc2_b': jax.random.normal(ks[13], (L, D), jnp.float32) * s,
        'fln_w': jnp.ones((D,), jnp.float32),
        'fln_b': jnp.zeros((D,), jnp.float32),
    }


def prepare_weights(p):
    """Kernel weight layout:
      * wqkv: bf16 fused QKV with HEAD-MAJOR columns [h: (q, k, v)] and
        ATTN_SCALE folded into the q columns/bias -> single head fold/unfold
        in-kernel and no per-layer q*scale multiply.
      * o_w / fc1_w / fc2_w: bf16 (halved weight DMA; f32 accumulation).
      * all small per-layer f32 params packed into one [L, 1, PACK_WIDTH]
        array (one DMA descriptor instead of ten per grid step).
    """
    L, D, F = NUM_LAYERS, HIDDEN, FFN
    nh, hd = NUM_HEADS, HEAD_DIM

    q_w = p['q_w'] * ATTN_SCALE
    q_b = p['q_b'] * ATTN_SCALE
    wqkv = jnp.concatenate(
        [jnp.concatenate([q_w[:, :, h * hd:(h + 1) * hd],
                          p['k_w'][:, :, h * hd:(h + 1) * hd],
                          p['v_w'][:, :, h * hd:(h + 1) * hd]], axis=-1)
         for h in range(nh)], axis=-1)                            # [L, D, 3D]
    bqkv = jnp.concatenate(
        [jnp.concatenate([q_b[:, h * hd:(h + 1) * hd],
                          p['k_b'][:, h * hd:(h + 1) * hd],
                          p['v_b'][:, h * hd:(h + 1) * hd]], axis=-1)
         for h in range(nh)], axis=-1)                            # [L, 3D]

    pieces = dict(bqkv=bqkv, o_b=p['o_b'], fc1_b=p['fc1_b'], fc2_b=p['fc2_b'],
                  ln1_w=p['ln1_w'], ln1_b=p['ln1_b'],
                  ln2_w=p['ln2_w'], ln2_b=p['ln2_b'])
    pack = jnp.concatenate([pieces[name] for name, _ in _PACK_FIELDS],
                           axis=-1).reshape(L, 1, PACK_WIDTH).astype(jnp.float32)

    return {
        'tok_emb': p['tok_emb'],
        'pos_emb': p['pos_emb'],
        'wqkv': wqkv.astype(jnp.bfloat16),
        'o_w': p['o_w'].astype(jnp.bfloat16),
        'fc1_w': p['fc1_w'].astype(jnp.bfloat16),
        'fc2_w': p['fc2_w'].astype(jnp.bfloat16),
        'pack': pack,
        'fln': jnp.stack([p['fln_w'], p['fln_b']], axis=0),       # [2, D]
    }


# ---------------------------------- main -------------------------------------
if __name__ == "__main__":
    key = jax.random.PRNGKey(0)
    pkey, tkey = jax.random.split(key)
    params = prepare_weights(init_params(pkey))

    # batch=2, total token length 12 -> 2 chunks of MAX_LENGTH=8
    B, T_TOTAL = 2, 12
    tokens = jax.random.randint(tkey, (B, T_TOTAL), 1, VOCAB_SIZE,
                                dtype=jnp.int32)

    z = frozen_clip_forward(tokens, params, use_pallas=True)
    z = jax.block_until_ready(z)

    # sanity: shape + agreement with the pure-JAX reference of the same math
    z_ref = frozen_clip_forward(tokens, params, use_pallas=False)
    z_ref = jax.block_until_ready(z_ref)

    n_chunks = math.ceil((T_TOTAL - 2) / (MAX_LENGTH - 2))
    assert z.shape == (B, n_chunks * MAX_LENGTH, HIDDEN), z.shape
    assert bool(jnp.all(jnp.isfinite(z)))
    # small slack for pl.reciprocal(approx=True) in the in-kernel softmax
    assert jnp.allclose(z, z_ref, atol=1e-2, rtol=1e-2), \
        float(jnp.max(jnp.abs(z - z_ref)))

    print("KERNEL_OK")
</pallas_src>

<mosaic_0001>
module attributes {stable_mosaic.version = 11 : i64} {
  func.func @clip_layer_kernel(%arg0: i32, %arg1: i32, %arg2: memref<4x8x128xf32, #tpu.memory_space<vmem>>, %arg3: memref<1x128x384xbf16, #tpu.memory_space<vmem>>, %arg4: memref<1x128x128xbf16, #tpu.memory_space<vmem>>, %arg5: memref<1x128x512xbf16, #tpu.memory_space<vmem>>, %arg6: memref<1x512x128xbf16, #tpu.memory_space<vmem>>, %arg7: memref<1x1x1664xf32, #tpu.memory_space<vmem>>, %arg8: memref<2x128xf32, #tpu.memory_space<vmem>>, %arg9: memref<4x8x128xf32, #tpu.memory_space<vmem>>, %arg10: memref<8x8xf32, #tpu.memory_space<vmem>>) attributes {dimension_semantics = [#tpu.dimension_semantics<parallel>, #tpu.dimension_semantics<arbitrary>], iteration_bounds = array<i64: 1, 2>, scalar_prefetch = 0 : i64, scratch_operands = 1 : i64, tpu.core_type = #tpu.core_type<tc>, window_params = [{transform_indices = @transform_0, window_bounds = array<i64: 4, 8, 128>}, {transform_indices = @transform_1, window_bounds = array<i64: 1, 128, 384>}, {transform_indices = @transform_2, window_bounds = array<i64: 1, 128, 128>}, {transform_indices = @transform_3, window_bounds = array<i64: 1, 128, 512>}, {transform_indices = @transform_4, window_bounds = array<i64: 1, 512, 128>}, {transform_indices = @transform_5, window_bounds = array<i64: 1, 1, 1664>}, {pipeline_mode = #tpu.pipeline_mode<synchronous>, transform_indices = @transform_6, window_bounds = array<i64: 2, 128>}, {transform_indices = @transform_7, window_bounds = array<i64: 4, 8, 128>}]} {
    %c0_i32 = arith.constant 0 : i32
    %0 = arith.cmpi eq, %arg1, %c0_i32 : i32
    %1 = arith.extui %0 : i1 to i32
    %c0_i32_0 = arith.constant 0 : i32
    %2 = arith.cmpi ne, %1, %c0_i32_0 : i32
    scf.if %2 {
      %c0_47 = arith.constant 0 : index
      %c0_48 = arith.constant 0 : index
      %c0_49 = arith.constant 0 : index
      %157 = vector.load %arg2[%c0_47, %c0_48, %c0_49] : memref<4x8x128xf32, #tpu.memory_space<vmem>>, vector<4x8x128xf32>
      %c0_50 = arith.constant 0 : index
      %c0_51 = arith.constant 0 : index
      %c0_52 = arith.constant 0 : index
      %158 = vector.load %arg9[%c0_50, %c0_51, %c0_52] : memref<4x8x128xf32, #tpu.memory_space<vmem>>, vector<4x8x128xf32>
      tpu.vector_store %arg9[%c0_50, %c0_51, %c0_52], %157 {strides = array<i32>} : memref<4x8x128xf32, #tpu.memory_space<vmem>>, vector<4x8x128xf32>,
      %159 = tpu.iota {dimensions = array<i32: 0>} : vector<8x8xi32>
      %160 = tpu.iota {dimensions = array<i32: 1>} : vector<8x8xi32>
      %161 = arith.cmpi sle, %160, %159 : vector<8x8xi32>
      %cst_53 = arith.constant 0.000000e+00 : f32
      %cst_54 = arith.constant -1.000000e+09 : f32
      %162 = vector.broadcast %cst_53 : f32 to vector<8x8xf32>
      %163 = vector.broadcast %cst_54 : f32 to vector<8x8xf32>
      %164 = arith.select %161, %162, %163 : vector<8x8xi1>, vector<8x8xf32>
      %c0_55 = arith.constant 0 : index
      %c0_56 = arith.constant 0 : index
      %165 = vector.load %arg10[%c0_55, %c0_56] : memref<8x8xf32, #tpu.memory_space<vmem>>, vector<8x8xf32>
      tpu.vector_store %arg10[%c0_55, %c0_56], %164 {strides = array<i32>} : memref<8x8xf32, #tpu.memory_space<vmem>>, vector<8x8xf32>,
    } else {
    }
    %c0 = arith.constant 0 : index
    %c0_1 = arith.constant 0 : index
    %c0_2 = arith.constant 0 : index
    %3 = vector.load %arg7[%c0, %c0_1, %c0_2] : memref<1x1x1664xf32, #tpu.memory_space<vmem>>, vector<1x1x1664xf32>
    %4 = vector.shape_cast %3 : vector<1x1x1664xf32> to vector<1664xf32>
    %5 = vector.extract_strided_slice %4 {offsets = [0], sizes = [384], strides = [1]} : vector<1664xf32> to vector<384xf32>
    %6 = vector.extract_strided_slice %4 {offsets = [384], sizes = [128], strides = [1]} : vector<1664xf32> to vector<128xf32>
    %7 = vector.extract_strided_slice %4 {offsets = [512], sizes = [512], strides = [1]} : vector<1664xf32> to vector<512xf32>
    %8 = vector.extract_strided_slice %4 {offsets = [1024], sizes = [128], strides = [1]} : vector<1664xf32> to vector<128xf32>
    %9 = vector.extract_strided_slice %4 {offsets = [1152], sizes = [128], strides = [1]} : vector<1664xf32> to vector<128xf32>
    %10 = vector.extract_strided_slice %4 {offsets = [1280], sizes = [128], strides = [1]} : vector<1664xf32> to vector<128xf32>
    %11 = vector.extract_strided_slice %4 {offsets = [1408], sizes = [128], strides = [1]} : vector<1664xf32> to vector<128xf32>
    %12 = vector.extract_strided_slice %4 {offsets = [1536], sizes = [128], strides = [1]} : vector<1664xf32> to vector<128xf32>
    %c0_3 = arith.constant 0 : index
    %c0_4 = arith.constant 0 : index
    %c0_5 = arith.constant 0 : index
    %13 = vector.load %arg9[%c0_3, %c0_4, %c0_5] : memref<4x8x128xf32, #tpu.memory_space<vmem>>, vector<4x8x128xf32>
    %c0_6 = arith.constant 0 : index
    %c0_7 = arith.constant 0 : index
    %14 = vector.load %arg10[%c0_6, %c0_7] : memref<8x8xf32, #tpu.memory_space<vmem>>, vector<8x8xf32>
    %c0_8 = arith.constant 0 : index
    %c0_9 = arith.constant 0 : index
    %c0_10 = arith.constant 0 : index
    %15 = vector.load %arg3[%c0_8, %c0_9, %c0_10] : memref<1x128x384xbf16, #tpu.memory_space<vmem>>, vector<1x128x384xbf16>
    %16 = vector.shape_cast %15 : vector<1x128x384xbf16> to vector<128x384xbf16>
    %c0_11 = arith.constant 0 : index
    %c0_12 = arith.constant 0 : index
    %c0_13 = arith.constant 0 : index
    %17 = vector.load %arg4[%c0_11, %c0_12, %c0_13] : memref<1x128x128xbf16, #tpu.memory_space<vmem>>, vector<1x128x128xbf16>
    %18 = vector.shape_cast %17 : vector<1x128x128xbf16> to vector<128x128xbf16>
    %c0_14 = arith.constant 0 : index
    %c0_15 = arith.constant 0 : index
    %c0_16 = arith.constant 0 : index
    %19 = vector.load %arg5[%c0_14, %c0_15, %c0_16] : memref<1x128x512xbf16, #tpu.memory_space<vmem>>, vector<1x128x512xbf16>
    %20 = vector.shape_cast %19 : vector<1x128x512xbf16> to vector<128x512xbf16>
    %c0_17 = arith.constant 0 : index
    %c0_18 = arith.constant 0 : index
    %c0_19 = arith.constant 0 : index
    %21 = vector.load %arg6[%c0_17, %c0_18, %c0_19] : memref<1x512x128xbf16, #tpu.memory_space<vmem>>, vector<1x512x128xbf16>
    %22 = vector.shape_cast %21 : vector<1x512x128xbf16> to vector<512x128xbf16>
    %cst = arith.constant dense<0.000000e+00> : vector<4x8xf32>
    %23 = vector.multi_reduction <add>, %13, %cst [2] : vector<4x8x128xf32> to vector<4x8xf32>
    %24 = vector.shape_cast %23 : vector<4x8xf32> to vector<4x8x1xf32>
    %cst_20 = arith.constant 1.280000e+02 : f32
    %25 = vector.broadcast %cst_20 : f32 to vector<4x8x1xf32>
    %26 = arith.divf %24, %25 : vector<4x8x1xf32>
    %27 = vector.broadcast %26 : vector<4x8x1xf32> to vector<4x8x128xf32>
    %28 = arith.subf %13, %27 : vector<4x8x128xf32>
    %29 = arith.mulf %28, %28 : vector<4x8x128xf32>
    %cst_21 = arith.constant dense<0.000000e+00> : vector<4x8xf32>
    %30 = vector.multi_reduction <add>, %29, %cst_21 [2] : vector<4x8x128xf32> to vector<4x8xf32>
    %31 = vector.shape_cast %30 : vector<4x8xf32> to vector<4x8x1xf32>
    %cst_22 = arith.constant 1.280000e+02 : f32
    %32 = vector.broadcast %cst_22 : f32 to vector<4x8x1xf32>
    %33 = arith.divf %31, %32 : vector<4x8x1xf32>
    %cst_23 = arith.constant 9.99999974E-6 : f32
    %34 = vector.broadcast %cst_23 : f32 to vector<4x8x1xf32>
    %35 = arith.addf %33, %34 : vector<4x8x1xf32>
    %36 = math.rsqrt %35 : vector<4x8x1xf32>
    %37 = vector.broadcast %36 : vector<4x8x1xf32> to vector<4x8x128xf32>
    %38 = arith.mulf %28, %37 : vector<4x8x128xf32>
    %39 = vector.shape_cast %9 : vector<128xf32> to vector<1x1x128xf32>
    %40 = vector.broadcast %39 : vector<1x1x128xf32> to vector<4x8x128xf32>
    %41 = arith.mulf %38, %40 : vector<4x8x128xf32>
    %42 = vector.shape_cast %10 : vector<128xf32> to vector<1x1x128xf32>
    %43 = vector.broadcast %42 : vector<1x1x128xf32> to vector<4x8x128xf32>
    %44 = arith.addf %41, %43 : vector<4x8x128xf32>
    %45 = vector.shape_cast %44 : vector<4x8x128xf32> to vector<32x128xf32>
    %46 = arith.truncf %45 : vector<32x128xf32> to vector<32x128xbf16>
    %cst_24 = arith.constant dense<0.000000e+00> : vector<32x384xf32>
    %47 = tpu.matmul %46, %16, %cst_24 {dimension_numbers = #tpu.dot_dimension_numbers<[1], [0], [0], [1], [0, 0, 1, 1], [], []>} : vector<32x128xbf16>, vector<128x384xbf16>, vector<32x384xf32> -> vector<32x384xf32>
    %48 = vector.shape_cast %5 : vector<384xf32> to vector<1x384xf32>
    %49 = vector.broadcast %48 : vector<1x384xf32> to vector<32x384xf32>
    %50 = arith.addf %47, %49 : vector<32x384xf32>
    %51 = vector.shape_cast %50 : vector<32x384xf32> to vector<4x8x384xf32>
    %52 = vector.extract_strided_slice %51 {offsets = [0, 0, 0], sizes = [4, 8, 192], strides = [1, 1, 1]} : vector<4x8x384xf32> to vector<4x8x192xf32>
    %53 = vector.extract_strided_slice %51 {offsets = [0, 0, 192], sizes = [4, 8, 192], strides = [1, 1, 1]} : vector<4x8x384xf32> to vector<4x8x192xf32>
    %54 = tpu.concatenate %52, %53 in 0 : vector<4x8x192xf32>, vector<4x8x192xf32> -> vector<8x8x192xf32>
    %55 = vector.extract_strided_slice %54 {offsets = [0, 0, 0], sizes = [8, 8, 64], strides = [1, 1, 1]} : vector<8x8x192xf32> to vector<8x8x64xf32>
    %56 = vector.extract_strided_slice %54 {offsets = [0, 0, 64], sizes = [8, 8, 64], strides = [1, 1, 1]} : vector<8x8x192xf32> to vector<8x8x64xf32>
    %57 = vector.extract_strided_slice %54 {offsets = [0, 0, 128], sizes = [8, 8, 64], strides = [1, 1, 1]} : vector<8x8x192xf32> to vector<8x8x64xf32>
    "tpu.trace_start"() <{level = 10 : i32, message = "bqd,bkd->bqk"}> : () -> ()
    %cst_25 = arith.constant dense<0.000000e+00> : vector<8x8x8xf32>
    %58 = tpu.matmul %55, %56, %cst_25 {dimension_numbers = #tpu.dot_dimension_numbers<[2], [2], [1], [1], [0, 0, 0, 1, 1, 1], [0], [0]>} : vector<8x8x64xf32>, vector<8x8x64xf32>, vector<8x8x8xf32> -> vector<8x8x8xf32>
    "tpu.trace_stop"() : () -> ()
    %59 = vector.shape_cast %14 : vector<8x8xf32> to vector<1x8x8xf32>
    %60 = vector.broadcast %59 : vector<1x8x8xf32> to vector<8x8x8xf32>
    %61 = arith.addf %58, %60 : vector<8x8x8xf32>
    %cst_26 = arith.constant dense<0xFF800000> : vector<8x8xf32>
    %62 = vector.multi_reduction <maximumf>, %61, %cst_26 [2] : vector<8x8x8xf32> to vector<8x8xf32>
    %63 = vector.shape_cast %62 : vector<8x8xf32> to vector<8x8x1xf32>
    %64 = vector.broadcast %63 : vector<8x8x1xf32> to vector<8x8x8xf32>
    %65 = arith.subf %61, %64 : vector<8x8x8xf32>
    %66 = math.exp %65 : vector<8x8x8xf32>
    %cst_27 = arith.constant dense<0.000000e+00> : vector<8x8xf32>
    %67 = vector.multi_reduction <add>, %66, %cst_27 [2] : vector<8x8x8xf32> to vector<8x8xf32>
    %68 = vector.shape_cast %67 : vector<8x8xf32> to vector<8x8x1xf32>
    %69 = tpu.reciprocal %68 {approx = true} : vector<8x8x1xf32> -> vector<8x8x1xf32>
    %70 = vector.broadcast %69 : vector<8x8x1xf32> to vector<8x8x8xf32>
    %71 = arith.mulf %66, %70 : vector<8x8x8xf32>
    "tpu.trace_start"() <{level = 10 : i32, message = "bqk,bkd->bqd"}> : () -> ()
    %cst_28 = arith.constant dense<0.000000e+00> : vector<8x8x64xf32>
    %72 = tpu.matmul %71, %57, %cst_28 {dimension_numbers = #tpu.dot_dimension_numbers<[2], [1], [1], [2], [0, 0, 0, 1, 1, 2], [0], [0]>} : vector<8x8x8xf32>, vector<8x8x64xf32>, vector<8x8x64xf32> -> vector<8x8x64xf32>
    "tpu.trace_stop"() : () -> ()
    %73 = vector.extract_strided_slice %72 {offsets = [0, 0, 0], sizes = [4, 8, 64], strides = [1, 1, 1]} : vector<8x8x64xf32> to vector<4x8x64xf32>
    %74 = vector.extract_strided_slice %72 {offsets = [4, 0, 0], sizes = [4, 8, 64], strides = [1, 1, 1]} : vector<8x8x64xf32> to vector<4x8x64xf32>
    %75 = tpu.concatenate %73, %74 in 2 : vector<4x8x64xf32>, vector<4x8x64xf32> -> vector<4x8x128xf32>
    %76 = vector.shape_cast %75 : vector<4x8x128xf32> to vector<32x128xf32>
    %77 = arith.truncf %76 : vector<32x128xf32> to vector<32x128xbf16>
    %cst_29 = arith.constant dense<0.000000e+00> : vector<32x128xf32>
    %78 = tpu.matmul %77, %18, %cst_29 {dimension_numbers = #tpu.dot_dimension_numbers<[1], [0], [0], [1], [0, 0, 1, 1], [], []>} : vector<32x128xbf16>, vector<128x128xbf16>, vector<32x128xf32> -> vector<32x128xf32>
    %79 = vector.shape_cast %6 : vector<128xf32> to vector<1x128xf32>
    %80 = vector.broadcast %79 : vector<1x128xf32> to vector<32x128xf32>
    %81 = arith.addf %78, %80 : vector<32x128xf32>
    %82 = vector.shape_cast %81 : vector<32x128xf32> to vector<4x8x128xf32>
    %83 = arith.addf %13, %82 : vector<4x8x128xf32>
    %cst_30 = arith.constant dense<0.000000e+00> : vector<4x8xf32>
    %84 = vector.multi_reduction <add>, %83, %cst_30 [2] : vector<4x8x128xf32> to vector<4x8xf32>
    %85 = vector.shape_cast %84 : vector<4x8xf32> to vector<4x8x1xf32>
    %cst_31 = arith.constant 1.280000e+02 : f32
    %86 = vector.broadcast %cst_31 : f32 to vector<4x8x1xf32>
    %87 = arith.divf %85, %86 : vector<4x8x1xf32>
    %88 = vector.broadcast %87 : vector<4x8x1xf32> to vector<4x8x128xf32>
    %89 = arith.subf %83, %88 : vector<4x8x128xf32>
    %90 = arith.mulf %89, %89 : vector<4x8x128xf32>
    %cst_32 = arith.constant dense<0.000000e+00> : vector<4x8xf32>
    %91 = vector.multi_reduction <add>, %90, %cst_32 [2] : vector<4x8x128xf32> to vector<4x8xf32>
    %92 = vector.shape_cast %91 : vector<4x8xf32> to vector<4x8x1xf32>
    %cst_33 = arith.constant 1.280000e+02 : f32
    %93 = vector.broadcast %cst_33 : f32 to vector<4x8x1xf32>
    %94 = arith.divf %92, %93 : vector<4x8x1xf32>
    %cst_34 = arith.constant 9.99999974E-6 : f32
    %95 = vector.broadcast %cst_34 : f32 to vector<4x8x1xf32>
    %96 = arith.addf %94, %95 : vector<4x8x1xf32>
    %97 = math.rsqrt %96 : vector<4x8x1xf32>
    %98 = vector.broadcast %97 : vector<4x8x1xf32> to vector<4x8x128xf32>
    %99 = arith.mulf %89, %98 : vector<4x8x128xf32>
    %100 = vector.shape_cast %11 : vector<128xf32> to vector<1x1x128xf32>
    %101 = vector.broadcast %100 : vector<1x1x128xf32> to vector<4x8x128xf32>
    %102 = arith.mulf %99, %101 : vector<4x8x128xf32>
    %103 = vector.shape_cast %12 : vector<128xf32> to vector<1x1x128xf32>
    %104 = vector.broadcast %103 : vector<1x1x128xf32> to vector<4x8x128xf32>
    %105 = arith.addf %102, %104 : vector<4x8x128xf32>
    %106 = vector.shape_cast %105 : vector<4x8x128xf32> to vector<32x128xf32>
    %cst_35 = arith.constant 0.000000e+00 : f32
    %107 = vector.broadcast %cst_35 : f32 to vector<32x128xf32>
    %108 = arith.truncf %106 : vector<32x128xf32> to vector<32x128xbf16>
    %109 = vector.extract_strided_slice %20 {offsets = [0, 0], sizes = [128, 256], strides = [1, 1]} : vector<128x512xbf16> to vector<128x256xbf16>
    %cst_36 = arith.constant dense<0.000000e+00> : vector<32x256xf32>
    %110 = tpu.matmul %108, %109, %cst_36 {dimension_numbers = #tpu.dot_dimension_numbers<[1], [0], [0], [1], [0, 0, 1, 1], [], []>} : vector<32x128xbf16>, vector<128x256xbf16>, vector<32x256xf32> -> vector<32x256xf32>
    %111 = vector.extract_strided_slice %7 {offsets = [0], sizes = [256], strides = [1]} : vector<512xf32> to vector<256xf32>
    %112 = vector.shape_cast %111 : vector<256xf32> to vector<1x256xf32>
    %113 = vector.broadcast %112 : vector<1x256xf32> to vector<32x256xf32>
    %114 = arith.addf %110, %113 : vector<32x256xf32>
    %cst_37 = arith.constant 1.702000e+00 : f32
    %115 = vector.broadcast %cst_37 : f32 to vector<32x256xf32>
    %116 = arith.mulf %115, %114 : vector<32x256xf32>
    %117 = arith.negf %116 : vector<32x256xf32>
    %118 = math.exp %117 : vector<32x256xf32>
    %cst_38 = arith.constant 1.000000e+00 : f32
    %119 = vector.broadcast %cst_38 : f32 to vector<32x256xf32>
    %120 = arith.addf %119, %118 : vector<32x256xf32>
    %121 = arith.divf %119, %120 : vector<32x256xf32>
    %122 = arith.mulf %114, %121 : vector<32x256xf32>
    %123 = arith.truncf %122 : vector<32x256xf32> to vector<32x256xbf16>
    %124 = vector.extract_strided_slice %22 {offsets = [0, 0], sizes = [256, 128], strides = [1, 1]} : vector<512x128xbf16> to vector<256x128xbf16>
    %cst_39 = arith.constant dense<0.000000e+00> : vector<32x128xf32>
    %125 = tpu.matmul %123, %124, %cst_39 {dimension_numbers = #tpu.dot_dimension_numbers<[1], [0], [0], [1], [0, 0, 1, 1], [], []>} : vector<32x256xbf16>, vector<256x128xbf16>, vector<32x128xf32> -> vector<32x128xf32>
    %126 = arith.addf %107, %125 : vector<32x128xf32>
    %127 = arith.truncf %106 : vector<32x128xf32> to vector<32x128xbf16>
    %128 = vector.extract_strided_slice %20 {offsets = [0, 256], sizes = [128, 256], strides = [1, 1]} : vector<128x512xbf16> to vector<128x256xbf16>
    %cst_40 = arith.constant dense<0.000000e+00> : vector<32x256xf32>
    %129 = tpu.matmul %127, %128, %cst_40 {dimension_numbers = #tpu.dot_dimension_numbers<[1], [0], [0], [1], [0, 0, 1, 1], [], []>} : vector<32x128xbf16>, vector<128x256xbf16>, vector<32x256xf32> -> vector<32x256xf32>
    %130 = vector.extract_strided_slice %7 {offsets = [256], sizes = [256], strides = [1]} : vector<512xf32> to vector<256xf32>
    %131 = vector.shape_cast %130 : vector<256xf32> to vector<1x256xf32>
    %132 = vector.broadcast %131 : vector<1x256xf32> to vector<32x256xf32>
    %133 = arith.addf %129, %132 : vector<32x256xf32>
    %cst_41 = arith.constant 1.702000e+00 : f32
    %134 = vector.broadcast %cst_41 : f32 to vector<32x256xf32>
    %135 = arith.mulf %134, %133 : vector<32x256xf32>
    %136 = arith.negf %135 : vector<32x256xf32>
    %137 = math.exp %136 : vector<32x256xf32>
    %cst_42 = arith.constant 1.000000e+00 : f32
    %138 = vector.broadcast %cst_42 : f32 to vector<32x256xf32>
    %139 = arith.addf %138, %137 : vector<32x256xf32>
    %140 = arith.divf %138, %139 : vector<32x256xf32>
    %141 = arith.mulf %133, %140 : vector<32x256xf32>
    %142 = arith.truncf %141 : vector<32x256xf32> to vector<32x256xbf16>
    %143 = vector.extract_strided_slice %22 {offsets = [256, 0], sizes = [256, 128], strides = [1, 1]} : vector<512x128xbf16> to vector<256x128xbf16>
    %cst_43 = arith.constant dense<0.000000e+00> : vector<32x128xf32>
    %144 = tpu.matmul %142, %143, %cst_43 {dimension_numbers = #tpu.dot_dimension_numbers<[1], [0], [0], [1], [0, 0, 1, 1], [], []>} : vector<32x256xbf16>, vector<256x128xbf16>, vector<32x128xf32> -> vector<32x128xf32>
    %145 = arith.addf %126, %144 : vector<32x128xf32>
    %146 = vector.shape_cast %8 : vector<128xf32> to vector<1x128xf32>
    %147 = vector.broadcast %146 : vector<1x128xf32> to vector<32x128xf32>
    %148 = arith.addf %145, %147 : vector<32x128xf32>
    %149 = vector.shape_cast %148 : vector<32x128xf32> to vector<4x8x128xf32>
    %150 = arith.addf %83, %149 : vector<4x8x128xf32>
    %c1_i32 = arith.constant 1 : i32
    %151 = arith.cmpi slt, %arg1, %c1_i32 : i32
    %152 = arith.extui %151 : i1 to i32
    %c0_i32_44 = arith.constant 0 : i32
    %153 = arith.cmpi ne, %152, %c0_i32_44 : i32
    scf.if %153 {
      %c0_47 = arith.constant 0 : index
      %c0_48 = arith.constant 0 : index
      %c0_49 = arith.constant 0 : index
      %157 = vector.load %arg9[%c0_47, %c0_48, %c0_49] : memref<4x8x128xf32, #tpu.memory_space<vmem>>, vector<4x8x128xf32>
      tpu.vector_store %arg9[%c0_47, %c0_48, %c0_49], %150 {strides = array<i32>} : memref<4x8x128xf32, #tpu.memory_space<vmem>>, vector<4x8x128xf32>,
    } else {
    }
    %c1_i32_45 = arith.constant 1 : i32
    %154 = arith.cmpi eq, %arg1, %c1_i32_45 : i32
    %155 = arith.extui %154 : i1 to i32
    %c0_i32_46 = arith.constant 0 : i32
    %156 = arith.cmpi ne, %155, %c0_i32_46 : i32
    scf.if %156 {
      %c0_47 = arith.constant 0 : index
      %c0_48 = arith.constant 0 : index
      %157 = vector.load %arg8[%c0_47, %c0_48] : memref<2x128xf32, #tpu.memory_space<vmem>>, vector<1x128xf32>
      %158 = vector.shape_cast %157 : vector<1x128xf32> to vector<128xf32>
      %c1 = arith.constant 1 : index
      %c0_49 = arith.constant 0 : index
      %159 = vector.load %arg8[%c1, %c0_49] : memref<2x128xf32, #tpu.memory_space<vmem>>, vector<1x128xf32>
      %160 = vector.shape_cast %159 : vector<1x128xf32> to vector<128xf32>
      %cst_50 = arith.constant dense<0.000000e+00> : vector<4x8xf32>
      %161 = vector.multi_reduction <add>, %150, %cst_50 [2] : vector<4x8x128xf32> to vector<4x8xf32>
      %162 = vector.shape_cast %161 : vector<4x8xf32> to vector<4x8x1xf32>
      %cst_51 = arith.constant 1.280000e+02 : f32
      %163 = vector.broadcast %cst_51 : f32 to vector<4x8x1xf32>
      %164 = arith.divf %162, %163 : vector<4x8x1xf32>
      %165 = vector.broadcast %164 : vector<4x8x1xf32> to vector<4x8x128xf32>
      %166 = arith.subf %150, %165 : vector<4x8x128xf32>
      %167 = arith.mulf %166, %166 : vector<4x8x128xf32>
      %cst_52 = arith.constant dense<0.000000e+00> : vector<4x8xf32>
      %168 = vector.multi_reduction <add>, %167, %cst_52 [2] : vector<4x8x128xf32> to vector<4x8xf32>
      %169 = vector.shape_cast %168 : vector<4x8xf32> to vector<4x8x1xf32>
      %cst_53 = arith.constant 1.280000e+02 : f32
      %170 = vector.broadcast %cst_53 : f32 to vector<4x8x1xf32>
      %171 = arith.divf %169, %170 : vector<4x8x1xf32>
      %cst_54 = arith.constant 9.99999974E-6 : f32
      %172 = vector.broadcast %cst_54 : f32 to vector<4x8x1xf32>
      %173 = arith.addf %171, %172 : vector<4x8x1xf32>
      %174 = math.rsqrt %173 : vector<4x8x1xf32>
      %175 = vector.broadcast %174 : vector<4x8x1xf32> to vector<4x8x128xf32>
      %176 = arith.mulf %166, %175 : vector<4x8x128xf32>
      %177 = vector.shape_cast %158 : vector<128xf32> to vector<1x1x128xf32>
      %178 = vector.broadcast %177 : vector<1x1x128xf32> to vector<4x8x128xf32>
      %179 = arith.mulf %176, %178 : vector<4x8x128xf32>
      %180 = vector.shape_cast %160 : vector<128xf32> to vector<1x1x128xf32>
      %181 = vector.broadcast %180 : vector<1x1x128xf32> to vector<4x8x128xf32>
      %182 = arith.addf %179, %181 : vector<4x8x128xf32>
      %c0_55 = arith.constant 0 : index
      %c0_56 = arith.constant 0 : index
      %c0_57 = arith.constant 0 : index
      %183 = vector.load %arg9[%c0_55, %c0_56, %c0_57] : memref<4x8x128xf32, #tpu.memory_space<vmem>>, vector<4x8x128xf32>
      tpu.vector_store %arg9[%c0_55, %c0_56, %c0_57], %182 {strides = array<i32>} : memref<4x8x128xf32, #tpu.memory_space<vmem>>, vector<4x8x128xf32>,
    } else {
    }
    return
  }
  func.func @transform_0(%arg0: i32, %arg1: i32) -> (i32, i32, i32) {
    %c0_i32 = arith.constant 0 : i32
    %c0_i32_0 = arith.constant 0 : i32
    %c0_i32_1 = arith.constant 0 : i32
    return %arg0, %c0_i32, %c0_i32_0 : i32, i32, i32
  }
  func.func @transform_1(%arg0: i32, %arg1: i32) -> (i32, i32, i32) {
    %c0_i32 = arith.constant 0 : i32
    %c0_i32_0 = arith.constant 0 : i32
    %c0_i32_1 = arith.constant 0 : i32
    return %arg1, %c0_i32, %c0_i32_0 : i32, i32, i32
  }
  func.func @transform_2(%arg0: i32, %arg1: i32) -> (i32, i32, i32) {
    %c0_i32 = arith.constant 0 : i32
    %c0_i32_0 = arith.constant 0 : i32
    %c0_i32_1 = arith.constant 0 : i32
    return %arg1, %c0_i32, %c0_i32_0 : i32, i32, i32
  }
  func.func @transform_3(%arg0: i32, %arg1: i32) -> (i32, i32, i32) {
    %c0_i32 = arith.constant 0 : i32
    %c0_i32_0 = arith.constant 0 : i32
    %c0_i32_1 = arith.constant 0 : i32
    return %arg1, %c0_i32, %c0_i32_0 : i32, i32, i32
  }
  func.func @transform_4(%arg0: i32, %arg1: i32) -> (i32, i32, i32) {
    %c0_i32 = arith.constant 0 : i32
    %c0_i32_0 = arith.constant 0 : i32
    %c0_i32_1 = arith.constant 0 : i32
    return %arg1, %c0_i32, %c0_i32_0 : i32, i32, i32
  }
  func.func @transform_5(%arg0: i32, %arg1: i32) -> (i32, i32, i32) {
    %c0_i32 = arith.constant 0 : i32
    %c0_i32_0 = arith.constant 0 : i32
    %c0_i32_1 = arith.constant 0 : i32
    return %arg1, %c0_i32, %c0_i32_0 : i32, i32, i32
  }
  func.func @transform_6(%arg0: i32, %arg1: i32) -> (i32, i32) {
    %c0_i32 = arith.constant 0 : i32
    %c0_i32_0 = arith.constant 0 : i32
    %c0_i32_1 = arith.constant 0 : i32
    return %c0_i32, %c0_i32_0 : i32, i32
  }
  func.func @transform_7(%arg0: i32, %arg1: i32) -> (i32, i32, i32) {
    %c0_i32 = arith.constant 0 : i32
    %c0_i32_0 = arith.constant 0 : i32
    %c0_i32_1 = arith.constant 0 : i32
    return %arg0, %c0_i32, %c0_i32_0 : i32, i32, i32
  }
}

</mosaic_0001>

<bundles_post_ra>
// kernel: tpu_custom_call.1
= control target key start
LH: loop header
LB: loop body
LE: loop exit
PB: predicated region body
PF: predicated region fallthrough
CT: control target
= control target key end

     0   :  { %s5409_s0 = inlined_call_operand.hbm [shape: f32[4,8,128], index: 0, kind: input, shape index: {}]   ;;  %s5410_s1 = inlined_call_operand.hbm [shape: bf16[2,128,384], index: 1, kind: input, shape index: {}]   ;;  %s5411_s2 = inlined_call_operand.hbm [shape: bf16[2,128,128], index: 2, kind: input, shape index: {}]   ;;  %s5412_s3 = inlined_call_operand.hbm [shape: bf16[2,128,512], index: 3, kind: input, shape index: {}]   ;;  %s5413_s4 = inlined_call_operand.hbm [shape: bf16[2,512,128], index: 4, kind: input, shape index: {}]   ;;  %s5414_s5 = inlined_call_operand.hbm [shape: f32[2,1,1664], index: 5, kind: input, shape index: {}]   ;;  %s5415_s6 = inlined_call_operand.vmem [shape: f32[2,128], index: 6, kind: input, shape index: {}]   ;;  %s5416_s7 = inlined_call_operand.hbm [shape: f32[4,8,128], index: 7, kind: output, shape index: {}]  }
   0x1   :  { %5431 = sst [smem:[#allocation24_spill]] %s5410_s1 }
   0x2   :  { %5432 = sst [smem:[#allocation25_spill]] %s5412_s3 }
   0x3   :  { %5433 = sst [smem:[#allocation26_spill]] %s5415_s6 }
   0x4   :  { %5434 = sst [smem:[#allocation27_spill]] %s5416_s7 }
   0x5   :  { %12 = vsyncpa [#allocation4], 0 }
   0x6   :  { %13 = vsyncpa [#allocation7], 0 }
   0x7   :  { %15 = vsyncpa [#allocation7 + $0x1], 0 }
   0x8   :  { %16 = vsyncpa [#allocation10], 0 }
   0x9   :  { %18 = vsyncpa [#allocation10 + $0x1], 0 }
   0xa   :  { %19 = vsyncpa [#allocation13], 0 }
   0xb   :  { %21 = vsyncpa [#allocation13 + $0x1], 0 }
   0xc   :  { %22 = vsyncpa [#allocation5], 0  ;;  %s4572_s24 = smov 0   ;;  %s4574_s25 = smov 0  }
   0xd   :  { %s4576_s26 = smov 0   ;;  %s4578_s27 = smov 0  }
   0xe   :  { %s4580_s28 = smov 0   ;;  %s4582_s29 = smov 0  }
   0xf LB: > { %5435 = sst [smem:[#allocation20_spill]] %s4496_s26  ;;  %s37_s30 = sadd.s32 1, %s4504_s28  ;;  %s4508_s29 = sphi %s4582_s29, %s28_s29   ;;  %s4504_s28 = sphi %s4580_s28, %s5463_s28   ;;  %s4500_s27 = sphi %s4578_s27, %s5462_s27   ;;  %s4496_s26 = sphi %s4576_s26, %s5458_s26   ;;  %s4492_s25 = sphi %s4574_s25, %s5461_s25   ;;  %s4488_s24 = sphi %s4572_s24, %s5460_s24  }
  0x10   : > { %5436 = sst [smem:[#allocation21_spill]] %s4508_s29  ;;  %s73_s8 = sadd.s32 1, %s4496_s26 }
  0x11   : > { %p38_p0 = scmp.ge.s32.totalorder %s37_s30, 2  ;;  %p80_p1 = scmp.ne.s32.totalorder %s4496_s26, %s4492_s25 }
  0x12   : > { %p81_p2 = scmp.eq.s32.totalorder %s4508_s29, 0  ;;  %p3913_p4 = scmp.lt.s32.totalorder %s4508_s29, 2 }
  0x13   : > { %s5465_s30 = smov (%p38_p0, %s37_s30), 0  ;;  %s5417_s10 = sand.u32 1, %s4508_s29  }
  0x14   : > { %5437 = sst [smem:[#allocation22_spill]] %s5465_s30  ;;  %p82_p3 = por %p81_p2, %p80_p1 }
  0x15   : > { %s70_s9 = ssub.s32 %s4504_s28, %s5465_s30  ;;  %s4614_s11 = sand.u32 1, %s4496_s26  }
  0x16   : > { %p71_p5 = scmp.eq.s32.totalorder %s70_s9, 0  ;;  %s3869_s12 = smul.u32 3072, %s4504_s28 }
  0x17   : > { %s3868_s14 = smul.u32 192, %s4614_s11  ;;  %s5439_s1 = sld [smem:[#allocation24_spill]] }
  0x18   : > { %s4618_s13 = scalar_select %p71_p5, %s4496_s26, %s73_s8  }
  0x19   : > { %p4626_p6 = pnand %p3913_p4, %p82_p3  ;;  %s284_s19 = scalar_lea.vmem [#allocation6], %s3868_s14 }
  0x1a   : > { %5438 = sst [smem:[#allocation23_spill]] %s4618_s13  ;;  %s291_s20 = sshll.u32 %s284_s19, 4  ;;  %s4630_s20 = int_to_ptr.vmem [resolvable:$true] %s291_s20 }
  0x1b   : > { %s5440_s18 = scalar_select %p4626_p6, 1, 0 }
  0x1c   : > { %s4634_s21 = scalar_lea.sflag [#allocation7], %s5417_s10  ;;  %p4640_p8 = pneg %p4626_p6 }
  0x1d   : > { %s4624_s17 = scalar_lea.hbm %s5439_s1, %s3869_s12  ;;  %s4243_s12 = scalar_lea.hbm %s5439_s1, 6144 }
  0x1e   : > { %s4238_s22 = scalar_lea.hbm %s4624_s17, 3072  ;;  %p4244_p11 = scmp.lt.u32.totalorder %s4624_s17, %s5439_s1 }
  0x1f   : > { %p4239_p7 = scmp.ne.s32.totalorder %s4624_s17, %s4238_s22  ;;  %p4245_p12 = scmp.lt.u32.totalorder %s4243_s12, %s4238_s22 }
  0x20   : > { %s5441_s23 = scalar_select %p4640_p8, 1, 0 }
  0x21   : > { %p4241_p9 = pnand %p4640_p8, %p4239_p7  ;;  %p4246_p13 = por %p4245_p12, %p4244_p11 }
  0x22   : > { %p4247_p0 = scmp.lt.u32.totalorder %s4238_s22, %s4624_s17 }
  0x23   : > { %p4242_p10 = pneg %p4241_p9 }
  0x24   : > { %p4248_p1 = por %p4247_p0, %p4246_p13 }
  0x26   : > { %p4249_p2 = pnand %p4248_p1, %p4242_p10 }
  0x28   : > { %4252 = shalt.err (!%p4249_p2)
}
  0x29   : > { %s4253_s16 = scalar_lea.vmem %s4630_s20, 3072  ;;  %s4510_s19 = smov [#allocation6]  }
  0x2a   : > { %p4254_p3 = scmp.ne.s32.totalorder %s4630_s20, %s4253_s16  ;;  %s4258_s8 = sshll.u32 %s4510_s19, 4  ;;  %s4259_s8 = int_to_ptr.vmem [resolvable:$false] %s4258_s8 }
  0x2b   : > { %s4260_s9 = scalar_lea.vmem %s4259_s8, 6144  ;;  %p4261_p7 = scmp.lt.s32.totalorder %s4630_s20, %s4259_s8 }
  0x2c   : > { %p4256_p4 = pnand %p4254_p3, %p4640_p8  ;;  %p4262_p9 = scmp.lt.s32.totalorder %s4260_s9, %s4253_s16 }
  0x2e   : > { %p4257_p5 = pneg %p4256_p4  ;;  %p4263_p11 = por %p4262_p9, %p4261_p7 }
  0x30   : > { %p4264_p12 = pnand %p4263_p11, %p4257_p5 }
  0x32   : > { %4267 = shalt.err (!%p4264_p12)
}
  0x33   : > { %s4511_s22 = smov 192   ;;  %s4512_s12 = smov 12  }
  0x34   : > { %3899 = dma.hbm_to_vmem [thread:$0]  (!%p4626_p6), %s4624_s17, 3072, %s4630_s20, %s4634_s21, %s4511_s22, %s4511_s22, %s4512_s12  }
  0x35   : > { %s3464_s14 = sshll.u32 %s4614_s11, 8  ;;  %s3622_s15 = sshll.u32 %s4504_s28, 12 }
  0x36   : > { %s5442_s3 = sld [smem:[#allocation25_spill]]  ;;  %s326_s9 = scalar_lea.vmem [#allocation9], %s3464_s14 }
  0x37   : > { %s333_s10 = sshll.u32 %s326_s9, 4  ;;  %s5443_s1 = sand.u32 1, %s4508_s29   ;;  %s4675_s10 = int_to_ptr.vmem [resolvable:$true] %s333_s10 }
  0x38   : > { %s4679_s30 = scalar_lea.sflag [#allocation10], %s5443_s1 }
  0x3c   : > { %s4671_s8 = scalar_lea.hbm %s5442_s3, %s3622_s15  ;;  %s4273_s12 = scalar_lea.hbm %s5442_s3, 8192 }
  0x3d   : > { %s4268_s17 = scalar_lea.hbm %s4671_s8, 4096  ;;  %p4274_p1 = scmp.lt.u32.totalorder %s4671_s8, %s5442_s3 }
  0x3e   : > { %p4269_p10 = scmp.ne.s32.totalorder %s4671_s8, %s4268_s17  ;;  %p4275_p2 = scmp.lt.u32.totalorder %s4273_s12, %s4268_s17 }
  0x3f   : > { %p4277_p4 = scmp.lt.u32.totalorder %s4268_s17, %s4671_s8 }
  0x40   : > { %p4271_p13 = pnand %p4269_p10, %p4640_p8  ;;  %p4276_p3 = por %p4275_p2, %p4274_p1 }
  0x42   : > { %p4272_p0 = pneg %p4271_p13  ;;  %p4278_p5 = por %p4277_p4, %p4276_p3 }
  0x44   : > { %p4279_p7 = pnand %p4278_p5, %p4272_p0 }
  0x46   : > { %4282 = shalt.err (!%p4279_p7)
}
  0x47   : > { %s4283_s1 = scalar_lea.vmem %s4675_s10, 4096  ;;  %s4513_s9 = smov [#allocation9]  }
  0x48   : > { %p4284_p9 = scmp.ne.s32.totalorder %s4675_s10, %s4283_s1  ;;  %s4288_s20 = sshll.u32 %s4513_s9, 4  ;;  %s4289_s20 = int_to_ptr.vmem [resolvable:$false] %s4288_s20 }
  0x49   : > { %s4290_s22 = scalar_lea.vmem %s4289_s20, 8192  ;;  %p4291_p10 = scmp.lt.s32.totalorder %s4675_s10, %s4289_s20 }
  0x4a   : > { %p4286_p11 = pnand %p4284_p9, %p4640_p8  ;;  %p4292_p13 = scmp.lt.s32.totalorder %s4290_s22, %s4283_s1 }
  0x4c   : > { %p4287_p12 = pneg %p4286_p11  ;;  %p4293_p1 = por %p4292_p13, %p4291_p10 }
  0x4e   : > { %p4294_p2 = pnand %p4293_p1, %p4287_p12 }
  0x50   : > { %4297 = shalt.err (!%p4294_p2)
}
  0x51   : > { %s4514_s17 = smov 256   ;;  %s4515_s12 = smov 16  }
  0x52   : > { %3905 = dma.hbm_to_vmem [thread:$0]  (!%p4626_p6), %s4671_s8, 4096, %s4675_s10, %s4679_s30, %s4514_s17, %s4514_s17, %s4515_s12  }
  0x53   : > { %s4708_s1 = scalar_lea.hbm %s5413_s4, %s3622_s15  ;;  %s347_s9 = scalar_lea.vmem [#allocation11], %s3464_s14 }
  0x54   : > { %s354_s20 = sshll.u32 %s347_s9, 4  ;;  %s4715_s22 = sadd.s32 4294967295, %s4508_s29   ;;  %s4712_s20 = int_to_ptr.vmem [resolvable:$true] %s354_s20 }
  0x55   : > { %p86_p0 = scmp.ne.s32.totalorder %s4492_s25, %s4488_s24  ;;  %p5423_p3 = scmp.eq.s32.totalorder %s4715_s22, 0 }
  0x56   : > { %p3457_p4 = scmp.ge.s32.totalorder %s4508_s29, 1  ;;  %p248_p5 = scmp.lt.s32.totalorder %s4508_s29, 3 }
  0x57   : > { %p4724_p7 = por %p5423_p3, %p86_p0  ;;  %s4516_s14 = smov [#allocation3]  }
  0x58   : > { %p4728_p9 = pnand %p3457_p4, %p248_p5  ;;  %s263_s8 = sshll.u32 %s4516_s14, 4  ;;  %s4732_s8 = int_to_ptr.vmem [resolvable:$true] %s263_s8 }
  0x59   : > { %s5444_s10 = scalar_select %p4724_p7, 1, 0 }
  0x5a   : > { %s5445_s15 = scalar_select %p4728_p9, 1, 0 }
  0x5b   : > { %p3892_p11 = pneg %p4728_p9  ;;  %s3461_s24 = sshll.u32 %s4614_s11, 6 }
  0x5c   : > { %s3621_s17 = sshll.u32 %s4504_s28, 10  ;;  %s305_s3 = scalar_lea.vmem [#allocation8], %s3461_s24 }
  0x5d   : > { %p4740_p12 = pnand %p3892_p11, %p5423_p3  ;;  %s4747_s9 = scalar_lea.hbm %s5411_s2, %s3621_s17 }
  0x5e   : > { %s312_s13 = sshll.u32 %s305_s3, 4  ;;  %s4298_s29 = scalar_lea.hbm %s5409_s0, 512  ;;  %s4749_s13 = int_to_ptr.vmem [resolvable:$true] %s312_s13 }
  0x5f   : > { %p4299_p10 = scmp.ne.s32.totalorder %s5409_s0, %s4298_s29  ;;  %p4300_p13 = pneg %p4740_p12 }
  0x60   : > { %p4305_p0 = scmp.lt.u32.totalorder %s4298_s29, %s5409_s0 }
  0x61   : > { %p4301_p1 = pnand %p4300_p13, %p4299_p10 }
  0x63   : > { %p4302_p2 = pneg %p4301_p1 }
  0x65   : > { %p4307_p4 = pnand %p4305_p0, %p4302_p2 }
  0x67   : > { %4310 = shalt.err (!%p4307_p4)
}
  0x68   : > { %s4311_s3 = scalar_lea.vmem %s4732_s8, 512  ;;  %p4319_p7 = scmp.lt.s32.totalorder %s4732_s8, %s4732_s8 }
  0x69   : > { %p4312_p5 = scmp.ne.s32.totalorder %s4732_s8, %s4311_s3  ;;  %p4320_p9 = scmp.lt.s32.totalorder %s4311_s3, %s4311_s3 }
  0x6b   : > { %p4314_p11 = pnand %p4312_p5, %p4300_p13  ;;  %p4321_p6 = por %p4320_p9, %p4319_p7 }
  0x6d   : > { %p4315_p3 = pneg %p4314_p11 }
  0x6f   : > { %p4322_p8 = pnand %p4321_p6, %p4315_p3 }
  0x71   : > { %4325 = shalt.err (!%p4322_p8)
}
  0x72   : > { %s4517_s6 = smov 128   ;;  %s4518_s7 = smov 8  }
  0x73   : > { %3895 = dma.hbm_to_vmem [thread:$0]  (!%p4740_p12), %s5409_s0, 512, %s4732_s8, [#allocation4], %s4517_s6, %s4517_s6, %s4518_s7  }
  0x74   : > { %s4326_s24 = scalar_lea.hbm %s4747_s9, 1024  ;;  %p5447_p13 = scmp.ne.s32.totalorder %s5441_s23, 0 }
  0x75   : > { %p4327_p10 = scmp.ne.s32.totalorder %s4747_s9, %s4326_s24  ;;  %s4331_s16 = scalar_lea.hbm %s5411_s2, 2048 }
  0x76   : > { %p4332_p8 = scmp.lt.u32.totalorder %s4747_s9, %s5411_s2  ;;  %p4333_p3 = scmp.lt.u32.totalorder %s4331_s16, %s4326_s24 }
  0x77   : > { %p4329_p7 = pnand %p4327_p10, %p5447_p13  ;;  %p4335_p1 = scmp.lt.u32.totalorder %s4326_s24, %s4747_s9 }
  0x78   : > { %p4334_p9 = por %p4333_p3, %p4332_p8 }
  0x79   : > { %p4330_p6 = pneg %p4329_p7 }
  0x7a   : > { %p4336_p2 = por %p4335_p1, %p4334_p9 }
  0x7c   : > { %p4337_p0 = pnand %p4336_p2, %p4330_p6 }
  0x7e   : > { %4340 = shalt.err (!%p4337_p0)
}
  0x7f   : > { %s4341_s8 = scalar_lea.vmem %s4749_s13, 1024  ;;  %s4519_s12 = smov [#allocation8]  }
  0x80   : > { %p4342_p12 = scmp.ne.s32.totalorder %s4749_s13, %s4341_s8  ;;  %s4346_s6 = sshll.u32 %s4519_s12, 4  ;;  %s4347_s6 = int_to_ptr.vmem [resolvable:$false] %s4346_s6 }
  0x81   : > { %s4348_s7 = scalar_lea.vmem %s4347_s6, 2048  ;;  %p4349_p11 = scmp.lt.s32.totalorder %s4749_s13, %s4347_s6 }
  0x82   : > { %p4344_p4 = pnand %p4342_p12, %p5447_p13  ;;  %p4350_p10 = scmp.lt.s32.totalorder %s4348_s7, %s4341_s8 }
  0x84   : > { %p4345_p5 = pneg %p4344_p4  ;;  %p4351_p7 = por %p4350_p10, %p4349_p11 }
  0x86   : > { %p4352_p8 = pnand %p4351_p7, %p4345_p5 }
  0x88   : > { %4355 = shalt.err (!%p4352_p8)
}
  0x89   : > { %s4520_s26 = smov 64   ;;  %s4521_s29 = smov 4  }
  0x8a   : > { %p5448_p6 = scmp.ne.s32.totalorder %s5440_s18, 0  ;;  %s4356_s24 = scalar_lea.hbm %s4708_s1, 4096 }
  0x8b   : > { %p4357_p3 = scmp.ne.s32.totalorder %s4708_s1, %s4356_s24  ;;  %s4361_s16 = scalar_lea.hbm %s5413_s4, 8192 }
  0x8c   : > { %3902 = dma.hbm_to_vmem [thread:$0]  (!%p5448_p6), %s4747_s9, 1024, %s4749_s13, %s4634_s21, %s4520_s26, %s4520_s26, %s4521_s29  }
  0x8d   : > { %p4359_p9 = pnand %p4357_p3, %p5447_p13  ;;  %p4362_p2 = scmp.lt.u32.totalorder %s4708_s1, %s5413_s4 }
  0x8e   : > { %p4363_p0 = scmp.lt.u32.totalorder %s4361_s16, %s4356_s24  ;;  %p4365_p4 = scmp.lt.u32.totalorder %s4356_s24, %s4708_s1 }
  0x8f   : > { %p4360_p1 = pneg %p4359_p9 }
  0x90   : > { %p4364_p12 = por %p4363_p0, %p4362_p2 }
  0x92   : > { %p4366_p5 = por %p4365_p4, %p4364_p12 }
  0x94   : > { %p4367_p11 = pnand %p4366_p5, %p4360_p1 }
  0x96   : > { %4370 = shalt.err (!%p4367_p11)
}
  0x97   : > { %s4371_s13 = scalar_lea.vmem %s4712_s20, 4096  ;;  %s4522_s21 = smov [#allocation11]  }
  0x98   : > { %p4372_p10 = scmp.ne.s32.totalorder %s4712_s20, %s4371_s13  ;;  %s4376_s9 = sshll.u32 %s4522_s21, 4  ;;  %s4377_s9 = int_to_ptr.vmem [resolvable:$false] %s4376_s9 }
  0x99   : > { %s4378_s8 = scalar_lea.vmem %s4377_s9, 8192  ;;  %p4379_p3 = scmp.lt.s32.totalorder %s4712_s20, %s4377_s9 }
  0x9a   : > { %p4374_p7 = pnand %p4372_p10, %p5447_p13  ;;  %p4380_p9 = scmp.lt.s32.totalorder %s4378_s8, %s4371_s13 }
  0x9c   : > { %p4375_p8 = pneg %p4374_p7  ;;  %p4381_p2 = por %p4380_p9, %p4379_p3 }
  0x9e   : > { %p4382_p0 = pnand %p4381_p2, %p4375_p8 }
  0xa0   : > { %4385 = shalt.err (!%p4382_p0)
}
  0xa1   : > { %3908 = dma.hbm_to_vmem [thread:$0]  (!%p5448_p6), %s4708_s1, 4096, %s4712_s20, %s4679_s30, %s4520_s26, %s4520_s26, %s4521_s29  }
  0xa2   : > { %s3870_s12 = smul.u32 13, %s4614_s11  ;;  %s365_s19 = scalar_lea.sflag [#allocation13], %s4614_s11 }
  0xa3   : > { %s3871_s6 = smul.u32 208, %s4504_s28  ;;  %s4391_s20 = scalar_lea.hbm %s5414_s5, 416 }
  0xa4   : > { %s368_s14 = scalar_lea.vmem [#allocation12], %s3870_s12 }
  0xa5   : > { %s4827_s17 = scalar_lea.hbm %s5414_s5, %s3871_s6  ;;  %s376_s16 = sshll.u32 %s368_s14, 4  ;;  %s377_s16 = int_to_ptr.vmem [resolvable:$true] %s376_s16 }
  0xa6   : > { %s4386_s3 = scalar_lea.hbm %s4827_s17, 208  ;;  %p4392_p5 = scmp.lt.u32.totalorder %s4827_s17, %s5414_s5 }
  0xa7   : > { %p4387_p1 = scmp.ne.s32.totalorder %s4827_s17, %s4386_s3  ;;  %p4393_p11 = scmp.lt.u32.totalorder %s4391_s20, %s4386_s3 }
  0xa8   : > { %p4395_p7 = scmp.lt.u32.totalorder %s4386_s3, %s4827_s17 }
  0xa9   : > { %p4389_p12 = pnand %p4387_p1, %p5447_p13  ;;  %p4394_p10 = por %p4393_p11, %p4392_p5 }
  0xab   : > { %p4390_p4 = pneg %p4389_p12  ;;  %p4396_p8 = por %p4395_p7, %p4394_p10 }
  0xad   : > { %p4397_p3 = pnand %p4396_p8, %p4390_p4 }
  0xaf   : > { %4400 = shalt.err (!%p4397_p3)
}
  0xb0   : > { %s4401_s11 = scalar_lea.vmem %s377_s16, 208  ;;  %s4523_s13 = smov [#allocation12]  }
  0xb1   : > { %p4402_p9 = scmp.ne.s32.totalorder %s377_s16, %s4401_s11  ;;  %s4406_s21 = sshll.u32 %s4523_s13, 4  ;;  %s4407_s21 = int_to_ptr.vmem [resolvable:$false] %s4406_s21 }
  0xb2   : > { %s4408_s9 = scalar_lea.vmem %s4407_s21, 416  ;;  %p4409_p1 = scmp.lt.s32.totalorder %s377_s16, %s4407_s21 }
  0xb3   : > { %p4404_p2 = pnand %p4402_p9, %p5447_p13  ;;  %p4410_p12 = scmp.lt.s32.totalorder %s4408_s9, %s4401_s11 }
  0xb5   : > { %p4405_p0 = pneg %p4404_p2  ;;  %p4411_p6 = por %p4410_p12, %p4409_p1 }
  0xb7   : > { %p4412_p5 = pnand %p4411_p6, %p4405_p0 }
  0xb9   : > { %4415 = shalt.err (!%p4412_p5)
}
  0xba   : > { %p5449_p11 = scmp.ne.s32.totalorder %s5440_s18, 0  ;;  %p5450_p4 = scmp.ne.s32.totalorder %s5445_s15, 0 }
  0xbb   : > { %p5451_p10 = scmp.eq.s32.totalorder (!%p5450_p4), %s4715_s22, 0 }
  0xbc   : > { %3911 = dma.hbm_to_vmem [thread:$0]  (!%p5449_p11), %s4827_s17, 208, %s377_s16, %s365_s19  }
  0xbd   : > { %385 = sbr.rel (%p5450_p4) target bundleno = 3262 (0xcbe), region = 48 }
  0xc4   : > { %4467 = dma.done.wait (%p5451_p10), [#allocation4], 512   ;;  %p5452_p13 = pmov %p5451_p10 }
  0xc5   : > { %s391_s23 = sand.u32 1, %s4715_s22   ;;  %s393_s8 = sand.u32 1, %s4492_s25  }
  0xc6   : > { %4469 = vsyncadd (%p5452_p13), [#allocation4], 4294966784  ;;  %s3872_s12 = smul.u32 192, %s393_s8  ;;  %s392_s6 = scalar_lea.sflag [#allocation7], %s391_s23 }
  0xc7   : > { %p5453_p6 = scmp.ne.s32.totalorder %s5444_s10, 0 }
  0xc8   : > { %s4855_s7 = scalar_lea.vmem [#allocation6], %s3872_s12 }
  0xc9   : > { %4471 = dma.done.wait (%p5453_p6), %s392_s6, 4096  }
  0xca   : > { %4473 = vsyncadd (%p5453_p6), %s392_s6, 4294963200  ;;  %s3473_s18 = sshll.u32 %s393_s8, 6  ;;  %s3474_s15 = sshll.u32 %s393_s8, 8 }
  0xcb   : > { %s4861_s24 = scalar_lea.vmem [#allocation8], %s3473_s18  ;;  %s410_s17 = scalar_lea.sflag [#allocation10], %s391_s23 }
  0xcc   : > { %s4863_s14 = scalar_lea.vmem [#allocation9], %s3474_s15 }
  0xcd   : > { %4475 = dma.done.wait (%p5453_p6), %s410_s17, 8192  }
  0xce   : > { %4477 = vsyncadd (%p5453_p6), %s410_s17, 4294959104  ;;  %s3873_s16 = smul.u32 13, %s393_s8  ;;  %s4869_s19 = scalar_lea.vmem [#allocation11], %s3474_s15 }
  0xcf   : > { %s428_s3 = scalar_lea.sflag [#allocation13], %s393_s8 }
  0xd0   : > { %s4871_s30 = scalar_lea.vmem [#allocation12], %s3873_s16 }
  0xd1   : > { %4479 = dma.done.wait (%p5453_p6), %s428_s3, 208  }
  0xd2   : > { %4481 = vsyncadd (%p5453_p6), %s428_s3, 4294967088  ;;  %p3476_p7 = scmp.ne.s32.totalorder %s4500_s27, 0 }
  0xd3   : > { %v484_v0 = vld [vmem:[#allocation3] sm:$0xff] (!%p3476_p7)  ;;  %v485_v1 = vld [vmem:[#allocation3 + $0x8] sm:$0xff] (!%p3476_p7)  ;;  %v486_v2 = vld [vmem:[#allocation3 + $0x10] sm:$0xff] (!%p3476_p7)  ;;  %v492_v3 = vlaneseq (!%p3476_p7)  ;;  %vm498_vm0 = vcmask (!%p3476_p7), 64512   ;;  %v4524_v7 = vmov (!%p3476_p7), -1e+09  }
  0xd4   : > { %483 = sbr.rel (%p3476_p7) target bundleno = 219 (0xdb), region = 76  ;;  %488 = vst [vmem:[#allocation14] sm:$0xff] (!%p3476_p7), %v484_v0  ;;  %489 = vst [vmem:[#allocation14 + $0x8] sm:$0xff] (!%p3476_p7), %v485_v1  ;;  %v487_v4 = vld [vmem:[#allocation3 + $0x18] sm:$0xff] (!%p3476_p7) }
  0xd5   : > { %490 = vst [vmem:[#allocation14 + $0x10] sm:$0xff] (!%p3476_p7), %v486_v2  ;;  %491 = vst [vmem:[#allocation14 + $0x18] sm:$0xff] (!%p3476_p7), %v487_v4  ;;  %v493_v5 = vshrl.u32 (!%p3476_p7), %v492_v3, 7  ;;  %v495_v6 = vand.u32 (!%p3476_p7), 127, %v492_v3 }
  0xd7   : > { %vm496_vm1 = vcmp.le.s32.totalorder (!%p3476_p7), %v495_v6, %v493_v5 }
  0xd8   : > { %v497_v8 = vsel (!%p3476_p7), %vm496_vm1, 0.0, %v4524_v7 }
  0xd9   : > { %499 = vst.msk [vmem:[#allocation2] sm:$0xff] (!%p3476_p7), %vm498_vm0, %v497_v8 }
  0xdb PF: > { %v502_v9 = vld [vmem:[#allocation14] sm:$0xff]  ;;  %v503_v11 = vld [vmem:[#allocation14 + $0x8] sm:$0xff]  ;;  %v4525_v48 = vmov 0   ;;  %v698_v59 = vlaneseq  ;;  %s4526_s10 = smov 64   ;;  %vm4528_vm2 = vmmov 0   ;;  %vm989_vm3 = vcmask 523264  }
  0xdc   : > { %v504_v10 = vld [vmem:[#allocation14 + $0x10] sm:$0xff]  ;;  %651 = vadd.xlane.f32.xlu0 %v502_v9  ;;  %v505_v12 = vld [vmem:[#allocation14 + $0x18] sm:$0xff]  ;;  %895 = vmatprep.mubr.bf16.mxu0 %v4525_v48  ;;  %vm1610_vm4 = vcmask 64512   ;;  %p3613_p8 = scmp.ge.s32.totalorder %s4500_s27, 1 }
  0xdd   : > { %655 = vadd.xlane.f32.xlu1 %v504_v10  ;;  %v3992_v13 = vld [vmem:[%s4855_s7 + $0x4] ss:$12 sps:$4 sm:$0xff]   ;;  %v3994_v14 = vld [vmem:[%s4855_s7] ss:$12 sps:$4 sm:$0xff]   ;;  %v3995_v15 = vld [vmem:[%s4855_s7 + $0x1c] ss:$12 sps:$4 sm:$0xff]  }
  0xde   : > { %v3997_v16 = vld [vmem:[%s4855_s7 + $0x8] ss:$12 sps:$4 sm:$0xff]   ;;  %863 = vmatprep.subr.bf16.mxu0 %v3992_v13  ;;  %v3998_v33 = vld [vmem:[%s4855_s7 + $0x18] ss:$12 sps:$4 sm:$0xff]   ;;  %v4001_v35 = vld [vmem:[%s4855_s7 + $0x20] ss:$12 sps:$4 sm:$0xff]  }
  0xdf   : > { %864 = vmatpush1.bf16.msra.mxu0 %v3994_v14  ;;  %3732 = vmatprep.subr.bf16.mxu1 %v3997_v16  ;;  %v3999_v34 = vld [vmem:[%s4855_s7 + $0x34] ss:$12 sps:$4 sm:$0xff]   ;;  %v4002_v36 = vld [vmem:[%s4855_s7 + $0x30] ss:$12 sps:$4 sm:$0xff]   ;;  %v4003_v37 = vld [vmem:[%s4855_s7 + $0x4c] ss:$12 sps:$4 sm:$0xff]  }
  0xe0   : > { %653 = vadd.xlane.f32.xlu0 %v503_v11  ;;  %865 = vmatprep.subr.bf16.mxu0 %v3995_v15  ;;  %v4005_v38 = vld [vmem:[%s4855_s7 + $0x38] ss:$12 sps:$4 sm:$0xff]   ;;  %v4006_v39 = vld [vmem:[%s4855_s7 + $0x48] ss:$12 sps:$4 sm:$0xff]   ;;  %v4009_v41 = vld [vmem:[%s4855_s7 + $0x50] ss:$12 sps:$4 sm:$0xff]  }
  0xe1   : > { %657 = vadd.xlane.f32.xlu1 %v505_v12  ;;  %3733 = vmatpush3.bf16.msra.mxu1 %v3997_v16  ;;  %v4007_v40 = vld [vmem:[%s4855_s7 + $0x64] ss:$12 sps:$4 sm:$0xff]   ;;  %v4010_v42 = vld [vmem:[%s4855_s7 + $0x60] ss:$12 sps:$4 sm:$0xff]   ;;  %v4011_v43 = vld [vmem:[%s4855_s7 + $0x7c] ss:$12 sps:$4 sm:$0xff]  }
  0xe2   : > { %3734 = vmatprep.subr.bf16.mxu1 %v4001_v35  ;;  %v4013_v44 = vld [vmem:[%s4855_s7 + $0x68] ss:$12 sps:$4 sm:$0xff]   ;;  %v4014_v45 = vld [vmem:[%s4855_s7 + $0x78] ss:$12 sps:$4 sm:$0xff]   ;;  %v4017_v47 = vld [vmem:[%s4855_s7 + $0x80] ss:$12 sps:$4 sm:$0xff]  }
  0xe3   : > { %866 = vmatpush1.bf16.msra.mxu0 %v3998_v33  ;;  %v4015_v46 = vld [vmem:[%s4855_s7 + $0x94] ss:$12 sps:$4 sm:$0xff]   ;;  %v4018_v49 = vld [vmem:[%s4855_s7 + $0x90] ss:$12 sps:$4 sm:$0xff]   ;;  %v4019_v50 = vld [vmem:[%s4855_s7 + $0xac] ss:$12 sps:$4 sm:$0xff]  }
  0xe4   : > { %867 = vmatprep.subr.bf16.mxu0 %v3999_v34  ;;  %v4021_v51 = vld [vmem:[%s4855_s7 + $0x98] ss:$12 sps:$4 sm:$0xff]   ;;  %v4022_v52 = vld [vmem:[%s4855_s7 + $0xa8] ss:$12 sps:$4 sm:$0xff]   ;;  %v4023_v53 = vld [vmem:[%s4855_s7 + $0xb0] ss:$12 sps:$4 sm:$0xff]  }
  0xe5   : > { %3735 = vmatpush3.bf16.msra.mxu1 %v4001_v35  ;;  %v699_v1 = vshrl.u32 %v698_v59, 7  ;;  %v4920_v3 = vld [vmem:[%s4871_s30 + $0x8] sm:$0x1f] }
  0xe6   : > { %3736 = vmatprep.subr.bf16.mxu1 %v4005_v38  ;;  %v697_v5 = vrot.slane %v4920_v3, 1 }
  0xe7   : > { %868 = vmatpush1.bf16.msra.mxu0 %v4002_v36  ;;  %v4923_v6 = vsub.s32 0, %v699_v1 }
  0xe8   : > { %869 = vmatprep.subr.bf16.mxu0 %v4003_v37 }
  0xe9   : > { %3737 = vmatpush3.bf16.msra.mxu1 %v4005_v38 }
  0xea   : > { %3738 = vmatprep.subr.bf16.mxu1 %v4009_v41 }
  0xeb   : > { %870 = vmatpush1.bf16.msra.mxu0 %v4006_v39 }
  0xec   : > { %871 = vmatprep.subr.bf16.mxu0 %v4007_v40 }
  0xed   : > { %3739 = vmatpush3.bf16.msra.mxu1 %v4009_v41 }
  0xee   : > { %3740 = vmatprep.subr.bf16.mxu1 %v4013_v44 }
  0xef   : > { %872 = vmatpush1.bf16.msra.mxu0 %v4010_v42  ;;  %v4527_v42 = vmov 0.0  }
  0xf0   : > { %873 = vmatprep.subr.bf16.mxu0 %v4011_v43 }
  0xf1   : > { %3741 = vmatpush3.bf16.msra.mxu1 %v4013_v44 }
  0xf2   : > { %3742 = vmatprep.subr.bf16.mxu1 %v4017_v47 }
  0xf3   : > { %874 = vmatpush1.bf16.msra.mxu0 %v4014_v45 }
  0xf4   : > { %875 = vmatprep.subr.bf16.mxu0 %v4015_v46 }
  0xf5   : > { %3743 = vmatpush3.bf16.msra.mxu1 %v4017_v47 }
  0xf6   : > { %3744 = vmatprep.subr.bf16.mxu1 %v4021_v51 }
  0xf7   : > { %876 = vmatpush1.bf16.msra.mxu0 %v4018_v49 }
  0xf8   : > { %877 = vmatprep.subr.bf16.mxu0 %v4019_v50 }
  0xf9   : > { %3745 = vmatpush3.bf16.msra.mxu1 %v4021_v51 }
  0xfa   : > { %3746 = vmatprep.subr.bf16.mxu1 %v4023_v53 }
  0xfb   : > { %878 = vmatpush1.bf16.msra.mxu0 %v4022_v52 }
  0xfc   : > { %3762 = vmatprep.subr.mxu0 %v4527_v42 }
  0xfd   : > { %3747 = vmatpush3.bf16.msra.mxu1 %v4023_v53 }
  0xfe   : > { %3752 = vmatprep.subr.mxu1 %v4527_v42 }
 0x169   : > { %v652_v17 = vpop.xlane.xlu0 %651 }
 0x16a   : > { %v656_v18 = vpop.xlane.xlu1 %655  ;;  %v660_v19 = vmul.f32 0.0078125, %v652_v17 }
 0x16b   : > { %v662_v20 = vmul.f32 0.0078125, %v656_v18 }
 0x16c   : > { %v4882_v21 = vsub.f32 %v502_v9, %v660_v19  ;;  %v701_v9 = vrot.slane %v697_v5, %v4923_v6 }
 0x16d   : > { %v4884_v22 = vsub.f32 %v504_v10, %v662_v20  ;;  %v654_v23 = vpop.xlane.xlu0 %653  ;;  %v707_v10 = vrot.slane %v4920_v3, 2 }
 0x16e   : > { %v658_v24 = vpop.xlane.xlu1 %657  ;;  %v661_v25 = vmul.f32 0.0078125, %v654_v23  ;;  %v668_v26 = vmul.f32 %v4882_v21, %v4882_v21 }
 0x16f   : > { %v663_v27 = vmul.f32 0.0078125, %v658_v24  ;;  %v670_v30 = vmul.f32 %v4884_v22, %v4884_v22  ;;  %v711_v15 = vrot.slane %v707_v10, %v4923_v6 }
 0x170   : > { %v4888_v28 = vsub.f32 %v503_v11, %v661_v25  ;;  %672 = vadd.xlane.f32.xlu0 %v668_v26 }
 0x171   : > { %v4890_v29 = vsub.f32 %v505_v12, %v663_v27 }
 0x172   : > { %v669_v31 = vmul.f32 %v4888_v28, %v4888_v28 }
 0x173   : > { %v671_v32 = vmul.f32 %v4890_v29, %v4890_v29 }
 0x174   : > { %676 = vadd.xlane.f32.xlu0 %v670_v30  ;;  %674 = vadd.xlane.f32.xlu1 %v669_v31  ;;  %v4936_v30 = vld [vmem:[%s4871_s30] sm:$0xff]  ;;  %v730_v31 = vsub.s32 2, %v699_v1 }
 0x175   : > { %v723_v52 = vrot.slane %v4936_v30, %v4923_v6 }
 0x176   : > { %v731_v34 = vrot.slane %v4936_v30, %v730_v31 }
 0x178   : > { %678 = vadd.xlane.f32.xlu1 %v671_v32 }
 0x1fd   : > { %v673_v54 = vpop.xlane.xlu0 %672 }
 0x1fe   : > { %v680_v55 = vmul.f32 0.0078125, %v673_v54 }
 0x200   : > { %v684_v56 = vadd.f32 1e-05, %v680_v55 }
 0x201   : > { %v675_v57 = vpop.xlane.xlu1 %674  ;;  %v677_v58 = vpop.xlane.xlu0 %676 }
 0x202   : > { %4112 = vrsqrt.f32 %v684_v56  ;;  %v681_v60 = vmul.f32 0.0078125, %v675_v57  ;;  %v682_v61 = vmul.f32 0.0078125, %v677_v58 }
 0x204   : > { %v685_v62 = vadd.f32 1e-05, %v681_v60  ;;  %v686_v63 = vadd.f32 1e-05, %v682_v61 }
 0x205   : > { %v679_v0 = vpop.xlane.xlu1 %678 }
 0x206   : > { %4114 = vrsqrt.f32 %v685_v62  ;;  %v683_v2 = vmul.f32 0.0078125, %v679_v0 }
 0x207   : > { %4116 = vrsqrt.f32 %v686_v63 }
 0x208   : > { %v687_v4 = vadd.f32 1e-05, %v683_v2 }
 0x20a   : > { %4118 = vrsqrt.f32 %v687_v4 }
 0x20c   : > { %v4113_v7 = vpop.eup %4112 }
 0x20d   : > { %v692_v8 = vmul.f32 %v4113_v7, %v4882_v21 }
 0x20f   : > { %v703_v14 = vmul.f32 %v701_v9, %v692_v8 }
 0x210   : > { %v4115_v11 = vpop.eup %4114 }
 0x211   : > { %v4117_v12 = vpop.eup %4116  ;;  %v693_v13 = vmul.f32 %v4115_v11, %v4888_v28  ;;  %v713_v19 = vadd.f32 %v711_v15, %v703_v14 }
 0x212   : > { %v694_v16 = vmul.f32 %v4117_v12, %v4884_v22  ;;  %v4933_v22 = vsub.s32 1, %v699_v1 }
 0x213   : > { %v704_v17 = vmul.f32 %v701_v9, %v693_v13 }
 0x214   : > { %v4119_v18 = vpop.eup %4118  ;;  %v705_v23 = vmul.f32 %v701_v9, %v694_v16 }
 0x215   : > { %v714_v20 = vadd.f32 %v711_v15, %v704_v17  ;;  %v695_v21 = vmul.f32 %v4119_v18, %v4890_v29  ;;  %v727_v29 = vrot.slane %v4936_v30, %v4933_v22  ;;  %v506_v18 = vld [vmem:[#allocation2] sm:$0xff] }
 0x216   : > { %v715_v26 = vadd.f32 %v711_v15, %v705_v23 }
 0x217   : > { %v717_v24 = vpack.c.bf16 %v714_v20, %v713_v19  ;;  %v706_v25 = vmul.f32 %v701_v9, %v695_v21 }
 0x219   : > { %896 = vmatmul.mubr.bf16.vlgmr.msra.gmra.mrb[0].mxu0 %v717_v24  ;;  %3748 = vmatprep.mubr.bf16.mxu1 %v717_v24  ;;  %v716_v27 = vadd.f32 %v711_v15, %v706_v25 }
 0x21a   : > { %905 = vmatprep.mubr.bf16.mxu0 %v4525_v48 }
 0x21b   : > { %v718_v28 = vpack.c.bf16 %v716_v27, %v715_v26 }
 0x21d   : > { %3749 = vmatmul.mubr.bf16.vlgmr.msra.gmra.mrb[0].mxu1 %v718_v28 }
 0x21e   : > { %3754 = vmatprep.mubr.msk.f32.mxu1 %vm4528_vm2, %v4527_v42 }
 0x221   : > { %906 = vmatmul.mubr.bf16.gmra.mrb[4].mxu0 %v718_v28 }
 0x222   : > { %3764 = vmatprep.mubr.msk.f32.mxu0 %vm4528_vm2, %v4527_v42 }
 0x2ec   : > { %v897_v32 = vpop.f32.mrb[0].mxu0 }
 0x2ed   : > { %v899_v33 = vpop.f32.mrb[1].mxu0  ;;  %v898_v55 = vadd.f32 %v897_v32, %v723_v52 }
 0x2ee   : > { %v4941_v35 = vadd.f32 %v899_v33, %v727_v29  ;;  %v901_v36 = vpop.f32.mrb[2].mxu0 }
 0x2ef   : > { %v903_v37 = vpop.f32.mrb[3].mxu0  ;;  %v902_v58 = vadd.f32 %v901_v36, %v723_v52 }
 0x2f0   : > { %v3750_v38 = vpop.f32.mrb[0].mxu1  ;;  %973 = vrot.lane.b32.xlu0 %v4941_v35, %s4526_s10  ;;  %v4957_v51 = vadd.f32 %v903_v37, %v727_v29 }
 0x2f1   : > { %v959_v39 = vadd.f32 %v3750_v38, %v731_v34  ;;  %v950_v40 = vpop.f32.mrb[1].mxu1 }
 0x2f2   : > { %v3751_v41 = vpop.f32.mrb[2].mxu1  ;;  %v951_v45 = vadd.f32 %v950_v40, %v731_v34 }
 0x2f3   : > { %v953_v43 = vpop.f32.mrb[3].mxu1  ;;  %983 = vrot.lane.b32.xlu1 %v959_v39, %s4526_s10  ;;  %v962_v56 = vadd.f32 %v3751_v41, %v731_v34 }
 0x2f4   : > { %v907_v44 = vpop.f32.mrb[4].mxu0  ;;  %v954_v54 = vadd.f32 %v953_v43, %v731_v34 }
 0x2f5   : > { %v909_v46 = vpop.f32.mrb[5].mxu0  ;;  %v908_v57 = vadd.f32 %v907_v44, %v723_v52 }
 0x2f6   : > { %v4952_v47 = vadd.f32 %v909_v46, %v727_v29  ;;  %v911_v49 = vpop.f32.mrb[6].mxu0 }
 0x2f7   : > { %v913_v50 = vpop.f32.mrb[7].mxu0  ;;  %975 = vrot.lane.b32.xlu1 %v951_v45, %s4526_s10  ;;  %v912_v59 = vadd.f32 %v911_v49, %v723_v52 }
 0x2f8   : > { %981 = vrot.lane.b32.xlu0 %v4952_v47, %s4526_s10  ;;  %v4961_v53 = vadd.f32 %v913_v50, %v727_v29 }
 0x2fb   : > { %977 = vrot.lane.b32.xlu1 %v4957_v51, %s4526_s10 }
 0x2fc   : > { %985 = vrot.lane.b32.xlu0 %v4961_v53, %s4526_s10 }
 0x2ff   : > { %979 = vrot.lane.b32.xlu1 %v954_v54, %s4526_s10 }
 0x300   : > { %999 = vrot.lane.b32.xlu0 %v898_v55, %s4526_s10 }
 0x303   : > { %987 = vrot.lane.b32.xlu1 %v962_v56, %s4526_s10 }
 0x304   : > { %1153 = vrot.lane.b32.xlu0 %v908_v57, %s4526_s10 }
 0x307   : > { %1076 = vrot.lane.b32.xlu1 %v902_v58, %s4526_s10 }
 0x30b   : > { %1230 = vrot.lane.b32.xlu1 %v912_v59, %s4526_s10 }
 0x362   : > { %v974_v61 = vpop.permute.xlu0 %973 }
 0x365   : > { %v4973_v60 = vpop.permute.xlu1 %983 }
 0x369   : > { %v4975_v62 = vpop.permute.xlu1 %975 }
 0x36a   : > { %v982_v63 = vpop.permute.xlu0 %981  ;;  %v990_v0 = vsel %vm989_vm3, %v974_v61, %v4975_v62 }
 0x36b   : > { %1306 = vrot.lane.b32.xlu0 %v990_v0, %s4526_s10  ;;  %v992_v4 = vsel %vm989_vm3, %v982_v63, %v4973_v60 }
 0x36d   : > { %v978_v1 = vpop.permute.xlu1 %977 }
 0x36e   : > { %v986_v2 = vpop.permute.xlu0 %985 }
 0x36f   : > { %1458 = vrot.lane.b32.xlu0 %v992_v4, %s4526_s10 }
 0x371   : > { %v4983_v5 = vpop.permute.xlu1 %979 }
 0x372   : > { %v1000_v7 = vpop.permute.xlu0 %999  ;;  %v991_v8 = vsel %vm989_vm3, %v978_v1, %v4983_v5 }
 0x373   : > { %1382 = vrot.lane.b32.xlu1 %v991_v8, %s4526_s10  ;;  %3753 = vmatpush3.xpose.msk.msra.mxu1 %vm989_vm3, %v1000_v7 }
 0x374   : > { %3757 = vmatprep.subr.mxu1 %v4527_v42 }
 0x375   : > { %v4990_v9 = vpop.permute.xlu1 %987 }
 0x376   : > { %3755 = vmatmul.mubr.msk.f32.vlgmr.msra.gmra.mrb[4].mxu1 %vm989_vm3, %v898_v55  ;;  %v1154_v10 = vpop.permute.xlu0 %1153  ;;  %v993_v11 = vsel %vm989_vm3, %v986_v2, %v4990_v9 }
 0x377   : > { %1534 = vrot.lane.b32.xlu1 %v993_v11, %s4526_s10  ;;  %3763 = vmatpush3.xpose.msk.msra.mxu0 %vm989_vm3, %v1154_v10 }
 0x378   : > { %3759 = vmatprep.mubr.msk.f32.mxu1 %vm4528_vm2, %v4527_v42  ;;  %3772 = vmatprep.subr.mxu0 %v4527_v42 }
 0x379   : > { %v1077_v12 = vpop.permute.xlu1 %1076 }
 0x37a   : > { %3758 = vmatpush3.xpose.msk.msra.mxu1 %vm989_vm3, %v1077_v12  ;;  %3765 = vmatmul.mubr.msk.f32.vlgmr.msra.gmra.mrb[8].mxu0 %vm989_vm3, %v908_v57 }
 0x37b   : > { %3767 = vmatprep.subr.mxu1 %v4527_v42  ;;  %3774 = vmatprep.mubr.msk.f32.mxu0 %vm4528_vm2, %v4527_v42 }
 0x37d   : > { %v1231_v13 = vpop.permute.xlu1 %1230  ;;  %3760 = vmatmul.mubr.msk.f32.vlgmr.msra.gmra.mrb[6].mxu1 %vm989_vm3, %v902_v58 }
 0x37e   : > { %3768 = vmatpush3.xpose.msk.msra.mxu1 %vm989_vm3, %v1231_v13  ;;  %3769 = vmatprep.mubr.msk.f32.mxu1 %vm4528_vm2, %v4527_v42 }
 0x37f   : > { %3777 = vmatprep.subr.mxu1 %v4527_v42 }
 0x381   : > { %3770 = vmatmul.mubr.msk.f32.vlgmr.msra.gmra.mrb[8].mxu1 %vm989_vm3, %v912_v59 }
 0x382   : > { %3779 = vmatprep.mubr.msk.f32.mxu1 %vm4528_vm2, %v4527_v42 }
 0x3dd   : > { %v1307_v14 = vpop.permute.xlu0 %1306 }
 0x3de   : > { %3773 = vmatpush3.xpose.msk.msra.mxu0 %vm989_vm3, %v1307_v14 }
 0x3df   : > { %3782 = vmatprep.subr.mxu0 %v4527_v42 }
 0x3e1   : > { %3775 = vmatmul.mubr.msk.f32.vlgmr.msra.gmra.mrb[10].mxu0 %vm989_vm3, %v990_v0  ;;  %v1459_v15 = vpop.permute.xlu0 %1458 }
 0x3e2   : > { %3783 = vmatpush3.xpose.msk.msra.mxu0 %vm989_vm3, %v1459_v15  ;;  %3784 = vmatprep.mubr.msk.f32.mxu0 %vm4528_vm2, %v4527_v42 }
 0x3e3   : > { %3792 = vmatprep.subr.mxu0 %v4527_v42 }
 0x3e5   : > { %v1383_v16 = vpop.permute.xlu1 %1382  ;;  %3785 = vmatmul.mubr.msk.f32.vlgmr.msra.gmra.mrb[12].mxu0 %vm989_vm3, %v992_v4 }
 0x3e6   : > { %3778 = vmatpush3.xpose.msk.msra.mxu1 %vm989_vm3, %v1383_v16  ;;  %3793 = vmatpush3.msra.mxu0 %v4941_v35 }
 0x3e7   : > { %3787 = vmatprep.subr.mxu1 %v4527_v42  ;;  %3794 = vmatprep.mubr.msk.f32.mxu0 %vm4528_vm2, %v4527_v42 }
 0x3e8   : > { %3802 = vmatprep.subr.mxu0 %v4527_v42 }
 0x3e9   : > { %v1535_v17 = vpop.permute.xlu1 %1534  ;;  %3780 = vmatmul.mubr.msk.f32.vlgmr.msra.gmra.mrb[10].mxu1 %vm989_vm3, %v991_v8 }
 0x3ea   : > { %3788 = vmatpush3.xpose.msk.msra.mxu1 %vm989_vm3, %v1535_v17  ;;  %3789 = vmatprep.mubr.msk.f32.mxu1 %vm4528_vm2, %v4527_v42 }
 0x3eb   : > { %3797 = vmatprep.subr.mxu1 %v4527_v42 }
 0x3ed   : > { %3790 = vmatmul.mubr.msk.f32.vlgmr.msra.gmra.mrb[12].mxu1 %vm989_vm3, %v993_v11 }
 0x3ee   : > { %3798 = vmatpush3.msra.mxu1 %v4957_v51  ;;  %3799 = vmatprep.mubr.msk.f32.mxu1 %vm4528_vm2, %v4527_v42 }
 0x3ef   : > { %3807 = vmatprep.subr.mxu1 %v4527_v42 }
 0x449   : > { %v1071_v19 = vpop.f32.mrb[4].mxu1 }
 0x44a   : > { %v1072_v20 = vadd.f32 %v1071_v19, %v506_v18  ;;  %v3756_v21 = vpop.f32.mrb[5].mxu1 }
 0x44c   : > { %v1611_v23 = vsel %vm1610_vm4, %v1072_v20, -inf }
 0x44d   : > { %1612 = vmax.xlane.f32.xlu0 %v1611_v23  ;;  %v1225_v24 = vpop.f32.mrb[8].mxu0 }
 0x44e   : > { %v1226_v25 = vadd.f32 %v1225_v24, %v506_v18  ;;  %v3766_v26 = vpop.f32.mrb[9].mxu0 }
 0x450   : > { %v1148_v27 = vpop.f32.mrb[6].mxu1  ;;  %v1617_v28 = vsel %vm1610_vm4, %v1226_v25, -inf }
 0x451   : > { %v1149_v31 = vadd.f32 %v1148_v27, %v506_v18  ;;  %v3761_v29 = vpop.f32.mrb[7].mxu1  ;;  %1618 = vmax.xlane.f32.xlu0 %v1617_v28 }
 0x453   : > { %v1614_v32 = vsel %vm1610_vm4, %v1149_v31, -inf }
 0x454   : > { %1615 = vmax.xlane.f32.xlu1 %v1614_v32  ;;  %v1302_v33 = vpop.f32.mrb[8].mxu1 }
 0x455   : > { %v1303_v34 = vadd.f32 %v1302_v33, %v506_v18  ;;  %v3771_v35 = vpop.f32.mrb[9].mxu1 }
 0x457   : > { %v1620_v36 = vsel %vm1610_vm4, %v1303_v34, -inf }
 0x458   : > { %1621 = vmax.xlane.f32.xlu0 %v1620_v36 }
 0x4b4   : > { %v1378_v37 = vpop.f32.mrb[10].mxu0 }
 0x4b5   : > { %v1379_v38 = vadd.f32 %v1378_v37, %v506_v18  ;;  %v3776_v39 = vpop.f32.mrb[11].mxu0 }
 0x4b7   : > { %v1623_v40 = vsel %vm1610_vm4, %v1379_v38, -inf }
 0x4b8   : > { %1624 = vmax.xlane.f32.xlu0 %v1623_v40  ;;  %v1530_v41 = vpop.f32.mrb[12].mxu0 }
 0x4b9   : > { %v1531_v43 = vadd.f32 %v1530_v41, %v506_v18  ;;  %v3786_v44 = vpop.f32.mrb[13].mxu0 }
 0x4bb   : > { %v1629_v45 = vsel %vm1610_vm4, %v1531_v43, -inf }
 0x4bc   : > { %v1454_v46 = vpop.f32.mrb[10].mxu1  ;;  %1630 = vmax.xlane.f32.xlu0 %v1629_v45 }
 0x4bd   : > { %v1455_v49 = vadd.f32 %v1454_v46, %v506_v18  ;;  %v3781_v50 = vpop.f32.mrb[11].mxu1 }
 0x4bf   : > { %v1626_v51 = vsel %vm1610_vm4, %v1455_v49, -inf }
 0x4c0   : > { %1627 = vmax.xlane.f32.xlu1 %v1626_v51  ;;  %v1606_v52 = vpop.f32.mrb[12].mxu1 }
 0x4c1   : > { %v1607_v54 = vadd.f32 %v1606_v52, %v506_v18  ;;  %v3791_v55 = vpop.f32.mrb[13].mxu1 }
 0x4c3   : > { %v1632_v56 = vsel %vm1610_vm4, %v1607_v54, -inf }
 0x4c4   : > { %1633 = vmax.xlane.f32.xlu1 %v1632_v56 }
 0x4da   : > { %v1613_v57 = vpop.xlane.xlu0 %1612 }
 0x4db   : > { %v1635_v58 = vsub.f32 %v1072_v20, %v1613_v57 }
 0x4dd   : > { %v1643_v59 = vmul.f32 1.442695, %v1635_v58 }
 0x4de   : > { %v1619_v61 = vpop.xlane.xlu0 %1618 }
 0x4df   : > { %4120 = vpow2.f32 %v1643_v59  ;;  %v1637_v63 = vsub.f32 %v1226_v25, %v1619_v61 }
 0x4e1   : > { %v1647_v0 = vmul.f32 1.442695, %v1637_v63  ;;  %v1616_v1 = vpop.xlane.xlu1 %1615 }
 0x4e2   : > { %v1636_v2 = vsub.f32 %v1149_v31, %v1616_v1 }
 0x4e3   : > { %4122 = vpow2.f32 %v1647_v0 }
 0x4e4   : > { %v1645_v4 = vmul.f32 1.442695, %v1636_v2 }
 0x4e5   : > { %v1622_v7 = vpop.xlane.xlu0 %1621 }
 0x4e6   : > { %4124 = vpow2.f32 %v1645_v4  ;;  %v1638_v8 = vsub.f32 %v1303_v34, %v1622_v7  ;;  %v4025_v4 = vld [vmem:[%s4861_s24 + $0x8] sm:$0xff]   ;;  %v4026_v7 = vld [vmem:[%s4861_s24 + $0x10] sm:$0xff]  }
 0x4e8   : > { %v1649_v10 = vmul.f32 1.442695, %v1638_v8 }
 0x4e9   : > { %v4121_v11 = vpop.eup %4120 }
 0x4ea   : > { %4126 = vpow2.f32 %v1649_v10  ;;  %v1659_v12 = vsel %vm1610_vm4, %v4121_v11, 0.0 }
 0x4eb   : > { %1660 = vadd.xlane.f32.xlu0 %v1659_v12  ;;  %v4028_v12 = vld [vmem:[%s4861_s24 + $0x20] sm:$0xff]  }
 0x4ed   : > { %v4123_v13 = vpop.eup %4122 }
 0x4ee   : > { %v1665_v14 = vsel %vm1610_vm4, %v4123_v13, 0.0 }
 0x4ef   : > { %1666 = vadd.xlane.f32.xlu0 %v1665_v14 }
 0x4f0   : > { %v4125_v15 = vpop.eup %4124 }
 0x4f1   : > { %v1662_v16 = vsel %vm1610_vm4, %v4125_v15, 0.0 }
 0x4f2   : > { %1663 = vadd.xlane.f32.xlu1 %v1662_v16 }
 0x4f4   : > { %v4127_v17 = vpop.eup %4126 }
 0x4f5   : > { %v1668_v18 = vsel %vm1610_vm4, %v4127_v17, 0.0 }
 0x4f6   : > { %1669 = vadd.xlane.f32.xlu1 %v1668_v18  ;;  %v4030_v18 = vld [vmem:[%s4861_s24 + $0x30] sm:$0xff]  }
 0x545   : > { %v1625_v19 = vpop.xlane.xlu0 %1624 }
 0x546   : > { %v1639_v20 = vsub.f32 %v1379_v38, %v1625_v19 }
 0x548   : > { %v1651_v21 = vmul.f32 1.442695, %v1639_v20 }
 0x549   : > { %v1631_v23 = vpop.xlane.xlu0 %1630 }
 0x54a   : > { %4128 = vpow2.f32 %v1651_v21  ;;  %v1641_v24 = vsub.f32 %v1531_v43, %v1631_v23  ;;  %v4031_v21 = vld [vmem:[%s4861_s24 + $0x38] sm:$0xff]  }
 0x54c   : > { %v1655_v25 = vmul.f32 1.442695, %v1641_v24 }
 0x54d   : > { %v1628_v26 = vpop.xlane.xlu1 %1627 }
 0x54e   : > { %4130 = vpow2.f32 %v1655_v25  ;;  %v1640_v27 = vsub.f32 %v1455_v49, %v1628_v26 }
 0x550   : > { %v1653_v28 = vmul.f32 1.442695, %v1640_v27 }
 0x551   : > { %v1634_v31 = vpop.xlane.xlu1 %1633 }
 0x552   : > { %4132 = vpow2.f32 %v1653_v28  ;;  %v1642_v29 = vsub.f32 %v1607_v54, %v1634_v31 }
 0x554   : > { %v4129_v32 = vpop.eup %4128  ;;  %v1657_v33 = vmul.f32 1.442695, %v1642_v29 }
 0x555   : > { %v1671_v34 = vsel %vm1610_vm4, %v4129_v32, 0.0 }
 0x556   : > { %4134 = vpow2.f32 %v1657_v33  ;;  %1672 = vadd.xlane.f32.xlu0 %v1671_v34 }
 0x558   : > { %v4131_v35 = vpop.eup %4130 }
 0x559   : > { %v1677_v36 = vsel %vm1610_vm4, %v4131_v35, 0.0 }
 0x55a   : > { %1678 = vadd.xlane.f32.xlu0 %v1677_v36 }
 0x55c   : > { %v4133_v37 = vpop.eup %4132 }
 0x55d   : > { %v1674_v38 = vsel %vm1610_vm4, %v4133_v37, 0.0 }
 0x55e   : > { %1675 = vadd.xlane.f32.xlu1 %v1674_v38 }
 0x560   : > { %v4135_v39 = vpop.eup %4134 }
 0x561   : > { %v1680_v40 = vsel %vm1610_vm4, %v4135_v39, 0.0 }
 0x562   : > { %1681 = vadd.xlane.f32.xlu1 %v1680_v40 }
 0x578   : > { %v1661_v41 = vpop.xlane.xlu0 %1660 }
 0x579   : > { %4136 = vrcp.f32 %v1661_v41 }
 0x57c   : > { %v1667_v43 = vpop.xlane.xlu0 %1666 }
 0x57d   : > { %4138 = vrcp.f32 %v1667_v43 }
 0x57f   : > { %v1664_v44 = vpop.xlane.xlu1 %1663 }
 0x580   : > { %4140 = vrcp.f32 %v1664_v44 }
 0x583   : > { %v4137_v45 = vpop.eup %4136  ;;  %v1670_v46 = vpop.xlane.xlu1 %1669 }
 0x584   : > { %v1691_v49 = vmul.f32 %v4137_v45, %v4121_v11  ;;  %4142 = vrcp.f32 %v1670_v46  ;;  %v2305_v45 = vrot.slane %v4936_v30, 3 }
 0x586   : > { %3795 = vmatmul.mubr.msk.f32.vlgmr.msra.gmra.mrb[14].mxu0 %vm1610_vm4, %v1691_v49  ;;  %v2309_v46 = vrot.slane %v2305_v45, %v4923_v6  ;;  %v4068_v45 = vld [vmem:[%s4863_s14 + $0xc0] ss:$16 sps:$4 sm:$0xff]  }
 0x587   : > { %v4139_v50 = vpop.eup %4138  ;;  %3803 = vmatpush3.msra.mxu0 %v4952_v47  ;;  %3804 = vmatprep.mubr.msk.f32.mxu0 %vm4528_vm2, %v4527_v42 }
 0x588   : > { %v1693_v51 = vmul.f32 %v4139_v50, %v4123_v13  ;;  %3812 = vmatprep.subr.mxu0 %v4527_v42 }
 0x58a   : > { %v4141_v52 = vpop.eup %4140  ;;  %3805 = vmatmul.mubr.msk.f32.vlgmr.msra.gmra.mrb[16].mxu0 %vm1610_vm4, %v1693_v51 }
 0x58b   : > { %v1692_v54 = vmul.f32 %v4141_v52, %v4125_v15  ;;  %3813 = vmatpush3.msra.mxu0 %v4975_v62  ;;  %3814 = vmatprep.mubr.msk.f32.mxu0 %vm4528_vm2, %v4527_v42  ;;  %v4029_v15 = vld [vmem:[%s4861_s24 + $0x28] sm:$0xff]  }
 0x58c   : > { %3822 = vmatprep.subr.mxu0 %v4527_v42 }
 0x58d   : > { %3800 = vmatmul.mubr.msk.f32.vlgmr.msra.gmra.mrb[14].mxu1 %vm1610_vm4, %v1692_v54 }
 0x58e   : > { %v4143_v47 = vpop.eup %4142  ;;  %3808 = vmatpush3.msra.mxu1 %v4961_v53  ;;  %3809 = vmatprep.mubr.msk.f32.mxu1 %vm4528_vm2, %v4527_v42 }
 0x58f   : > { %v1694_v55 = vmul.f32 %v4143_v47, %v4127_v17  ;;  %3817 = vmatprep.subr.mxu1 %v4527_v42  ;;  %v4224_v47 = vld [vmem:[#allocation14] sm:$0xff] }
 0x591   : > { %3810 = vmatmul.mubr.msk.f32.vlgmr.msra.gmra.mrb[16].mxu1 %vm1610_vm4, %v1694_v55 }
 0x592   : > { %3818 = vmatpush3.msra.mxu1 %v4983_v5  ;;  %3819 = vmatprep.mubr.msk.f32.mxu1 %vm4528_vm2, %v4527_v42 }
 0x593   : > { %3827 = vmatprep.subr.mxu1 %v4527_v42 }
 0x5e3   : > { %v1673_v62 = vpop.xlane.xlu0 %1672 }
 0x5e4   : > { %4144 = vrcp.f32 %v1673_v62 }
 0x5e7   : > { %v1679_v56 = vpop.xlane.xlu0 %1678 }
 0x5e8   : > { %4146 = vrcp.f32 %v1679_v56 }
 0x5eb   : > { %v1676_v53 = vpop.xlane.xlu1 %1675 }
 0x5ec   : > { %4148 = vrcp.f32 %v1676_v53 }
 0x5ee   : > { %v4145_v57 = vpop.eup %4144 }
 0x5ef   : > { %v1695_v58 = vmul.f32 %v4145_v57, %v4129_v32  ;;  %v1682_v59 = vpop.xlane.xlu1 %1681  ;;  %v4225_v57 = vld [vmem:[#allocation14 + $0x8] sm:$0xff] }
 0x5f0   : > { %4150 = vrcp.f32 %v1682_v59 }
 0x5f1   : > { %3815 = vmatmul.mubr.msk.f32.vlgmr.msra.gmra.mrb[18].mxu0 %vm1610_vm4, %v1695_v58  ;;  %v4226_v58 = vld [vmem:[#allocation14 + $0x18] sm:$0xff] }
 0x5f2   : > { %v4147_v5 = vpop.eup %4146  ;;  %3823 = vmatpush3.msra.mxu0 %v4973_v60  ;;  %3824 = vmatprep.mubr.msk.f32.mxu0 %vm4528_vm2, %v4527_v42  ;;  %v4024_v60 = vld [vmem:[%s4861_s24] sm:$0xff]  }
 0x5f3   : > { %v1697_v61 = vmul.f32 %v4147_v5, %v4131_v35  ;;  %3832 = vmatprep.subr.bf16.mxu0 %v4024_v60  ;;  %v4227_v5 = vld [vmem:[#allocation14 + $0x10] sm:$0xff] }
 0x5f5   : > { %3825 = vmatmul.mubr.msk.f32.vlgmr.msra.gmra.mrb[20].mxu0 %vm1610_vm4, %v1697_v61 }
 0x5f6   : > { %v4149_v63 = vpop.eup %4148  ;;  %3833 = vmatpush3.bf16.msra.mxu0 %v4024_v60  ;;  %v4040_v60 = vld [vmem:[%s4863_s14 + $0x24] ss:$16 sps:$4 sm:$0xff]  }
 0x5f7   : > { %v1696_v0 = vmul.f32 %v4149_v63, %v4133_v37  ;;  %3834 = vmatprep.subr.bf16.mxu0 %v4025_v4  ;;  %v4032_v63 = vld [vmem:[%s4863_s14] ss:$16 sps:$4 sm:$0xff]  }
 0x5f9   : > { %3820 = vmatmul.mubr.msk.f32.vlgmr.msra.gmra.mrb[18].mxu1 %vm1610_vm4, %v1696_v0  ;;  %v4034_v0 = vld [vmem:[%s4863_s14 + $0x4] ss:$16 sps:$4 sm:$0xff]  }
 0x5fa   : > { %v4151_v1 = vpop.eup %4150  ;;  %3828 = vmatpush3.msra.mxu1 %v4990_v9  ;;  %3829 = vmatprep.mubr.msk.f32.mxu1 %vm4528_vm2, %v4527_v42  ;;  %v4027_v9 = vld [vmem:[%s4861_s24 + $0x18] sm:$0xff]  }
 0x5fb   : > { %v1698_v2 = vmul.f32 %v4151_v1, %v4135_v39  ;;  %3835 = vmatpush3.bf16.msra.mxu0 %v4025_v4  ;;  %v4035_v1 = vld [vmem:[%s4863_s14 + $0x8] ss:$16 sps:$4 sm:$0xff]   ;;  %2569 = vmatprep.subr.bf16.mxu1 %v4034_v0  ;;  %v4043_v4 = vld [vmem:[%s4863_s14 + $0x2c] ss:$16 sps:$4 sm:$0xff]  }
 0x5fc   : > { %3836 = vmatprep.subr.bf16.mxu0 %v4026_v7 }
 0x5fd   : > { %3830 = vmatmul.mubr.msk.f32.vlgmr.msra.gmra.mrb[20].mxu1 %vm1610_vm4, %v1698_v2  ;;  %v4037_v2 = vld [vmem:[%s4863_s14 + $0xc] ss:$16 sps:$4 sm:$0xff]  }
 0x5fe   : > { %2601 = vmatprep.mubr.bf16.mxu1 %v4525_v48  ;;  %2570 = vmatpush1.bf16.msra.mxu1 %v4032_v63 }
 0x5ff   : > { %3837 = vmatpush3.bf16.msra.mxu0 %v4026_v7  ;;  %v4038_v7 = vld [vmem:[%s4863_s14 + $0x20] ss:$16 sps:$4 sm:$0xff]   ;;  %2571 = vmatprep.subr.bf16.mxu1 %v4040_v60  ;;  %v2456_v60 = vrot.slane %v4920_v3, 3 }
 0x600   : > { %3838 = vmatprep.subr.bf16.mxu0 %v4027_v9 }
 0x602   : > { %2572 = vmatpush1.bf16.msra.mxu1 %v4038_v7  ;;  %v2466_v7 = vrot.slane %v4920_v3, 4 }
 0x603   : > { %3839 = vmatpush3.bf16.msra.mxu0 %v4027_v9 }
 0x604   : > { %3840 = vmatprep.subr.bf16.mxu0 %v4028_v12 }
 0x607   : > { %3841 = vmatpush3.bf16.msra.mxu0 %v4028_v12 }
 0x608   : > { %3842 = vmatprep.subr.bf16.mxu0 %v4029_v15 }
 0x60b   : > { %3843 = vmatpush3.bf16.msra.mxu0 %v4029_v15 }
 0x60c   : > { %3844 = vmatprep.subr.bf16.mxu0 %v4030_v18 }
 0x60f   : > { %3845 = vmatpush3.bf16.msra.mxu0 %v4030_v18 }
 0x610   : > { %3846 = vmatprep.subr.bf16.mxu0 %v4031_v21 }
 0x613   : > { %3847 = vmatpush3.bf16.msra.mxu0 %v4031_v21 }
 0x614   : > { %2781 = vmatprep.subr.bf16.mxu0 %v4037_v2 }
 0x659   : > { %v1768_v8 = vpop.f32.mrb[14].mxu0 }
 0x65a   : > { %v3796_v10 = vpop.f32.mrb[15].mxu0 }
 0x65d   : > { %v1914_v42 = vpop.f32.mrb[16].mxu0 }
 0x65e   : > { %v3806_v11 = vpop.f32.mrb[17].mxu0 }
 0x660   : > { %v1841_v13 = vpop.f32.mrb[14].mxu1 }
 0x661   : > { %v3801_v14 = vpop.f32.mrb[15].mxu1 }
 0x664   : > { %v1987_v16 = vpop.f32.mrb[16].mxu1 }
 0x665   : > { %v3811_v17 = vpop.f32.mrb[17].mxu1 }
 0x6c4   : > { %v2060_v19 = vpop.f32.mrb[18].mxu0 }
 0x6c5   : > { %v3816_v20 = vpop.f32.mrb[19].mxu0 }
 0x6c8   : > { %v2206_v23 = vpop.f32.mrb[20].mxu0 }
 0x6c9   : > { %v3826_v24 = vpop.f32.mrb[21].mxu0 }
 0x6cc   : > { %v2133_v25 = vpop.f32.mrb[18].mxu1 }
 0x6cd   : > { %v3982_v26 = vpack.i.bf16 %v2133_v25, %v2060_v19  ;;  %v3821_v27 = vpop.f32.mrb[19].mxu1  ;;  %v4046_v25 = vld [vmem:[%s4863_s14 + $0x44] ss:$16 sps:$4 sm:$0xff]  }
 0x6ce   : > { %v4044_v27 = vld [vmem:[%s4863_s14 + $0x40] ss:$16 sps:$4 sm:$0xff]   ;;  %2573 = vmatprep.subr.bf16.mxu1 %v4046_v25 }
 0x6cf   : > { %3983 = vrot.lane.b32.xlu0 %v3982_v26, %s4526_s10  ;;  %v4049_v26 = vld [vmem:[%s4863_s14 + $0x4c] ss:$16 sps:$4 sm:$0xff]   ;;  %2574 = vmatpush1.bf16.msra.mxu1 %v4044_v27  ;;  %v4081_v27 = vld [vmem:[%s4869_s19 + $0x80] sm:$0xff]  }
 0x6d0   : > { %v2279_v28 = vpop.f32.mrb[20].mxu1 }
 0x6d1   : > { %v3987_v31 = vpack.i.bf16 %v2279_v28, %v2206_v23  ;;  %v3831_v29 = vpop.f32.mrb[21].mxu1  ;;  %v4047_v28 = vld [vmem:[%s4863_s14 + $0x48] ss:$16 sps:$4 sm:$0xff]  }
 0x6d2   : > { %v4055_v29 = vld [vmem:[%s4863_s14 + $0x6c] ss:$16 sps:$4 sm:$0xff]  }
 0x6d3   : > { %3988 = vrot.lane.b32.xlu1 %v3987_v31, %s4526_s10  ;;  %v4052_v31 = vld [vmem:[%s4863_s14 + $0x64] ss:$16 sps:$4 sm:$0xff]  }
 0x6d4   : > { %2575 = vmatprep.subr.bf16.mxu1 %v4052_v31  ;;  %v5179_v31 = vld [vmem:[%s4869_s19] sm:$0xff]  }
 0x741   : > { %v3984_v32 = vpop.permute.xlu0 %3983 }
 0x742   : > { %v3986_v33 = vunpack.i.h.bf16 %v3984_v32  ;;  %v3985_v34 = vunpack.i.l.bf16 %v3984_v32  ;;  %v4050_v32 = vld [vmem:[%s4863_s14 + $0x60] ss:$16 sps:$4 sm:$0xff]  }
 0x743   : > { %2576 = vmatpush1.bf16.msra.mxu1 %v4050_v32  ;;  %v5185_v32 = vld [vmem:[%s4869_s19 + $0x48] sm:$0xff]  }
 0x744   : > { %v2299_v35 = vsel %vm989_vm3, %v1768_v8, %v3985_v34  ;;  %v2300_v36 = vsel %vm989_vm3, %v1841_v13, %v3986_v33  ;;  %v4041_v8 = vld [vmem:[%s4863_s14 + $0x28] ss:$16 sps:$4 sm:$0xff]   ;;  %v4058_v34 = vld [vmem:[%s4863_s14 + $0x84] ss:$16 sps:$4 sm:$0xff]  }
 0x745   : > { %v3989_v37 = vpop.permute.xlu1 %3988  ;;  %v2303_v38 = vpack.c.bf16 %v2300_v36, %v2299_v35  ;;  %v4053_v33 = vld [vmem:[%s4863_s14 + $0x68] ss:$16 sps:$4 sm:$0xff]   ;;  %v4061_v35 = vld [vmem:[%s4863_s14 + $0x8c] ss:$16 sps:$4 sm:$0xff]   ;;  %v4056_v36 = vld [vmem:[%s4863_s14 + $0x80] ss:$16 sps:$4 sm:$0xff]   ;;  %2577 = vmatprep.subr.bf16.mxu1 %v4058_v34 }
 0x746   : > { %v3991_v39 = vunpack.i.h.bf16 %v3989_v37  ;;  %v3990_v40 = vunpack.i.l.bf16 %v3989_v37  ;;  %v4059_v37 = vld [vmem:[%s4863_s14 + $0x88] ss:$16 sps:$4 sm:$0xff]   ;;  %v4088_v34 = vld [vmem:[%s4869_s19 + $0xd0] sm:$0xff]  }
 0x747   : > { %3848 = vmatprep.mubr.bf16.mxu0 %v2303_v38  ;;  %2578 = vmatpush1.bf16.msra.mxu1 %v4056_v36  ;;  %v4064_v38 = vld [vmem:[%s4863_s14 + $0xa4] ss:$16 sps:$4 sm:$0xff]  }
 0x748   : > { %v2302_v41 = vsel %vm989_vm3, %v1987_v16, %v3991_v39  ;;  %v2301_v43 = vsel %vm989_vm3, %v1914_v42, %v3990_v40  ;;  %v4067_v39 = vld [vmem:[%s4863_s14 + $0xac] ss:$16 sps:$4 sm:$0xff]   ;;  %v4062_v40 = vld [vmem:[%s4863_s14 + $0xa0] ss:$16 sps:$4 sm:$0xff]   ;;  %2579 = vmatprep.subr.bf16.mxu1 %v4064_v38 }
 0x749   : > { %v2304_v44 = vpack.c.bf16 %v2302_v41, %v2301_v43  ;;  %v4065_v41 = vld [vmem:[%s4863_s14 + $0xa8] ss:$16 sps:$4 sm:$0xff]   ;;  %v4070_v43 = vld [vmem:[%s4863_s14 + $0xc4] ss:$16 sps:$4 sm:$0xff]  }
 0x74a   : > { %v5195_v36 = vld [vmem:[%s4869_s19 + $0x50] sm:$0xff]   ;;  %v4092_v38 = vld [vmem:[%s4869_s19 + $0xd8] sm:$0xff]  }
 0x74b   : > { %3849 = vmatmul.mubr.bf16.vlgmr.msra.gmra.mrb[24].mxu0 %v2304_v44  ;;  %2580 = vmatpush1.bf16.msra.mxu1 %v4062_v40  ;;  %v4073_v44 = vld [vmem:[%s4863_s14 + $0xcc] ss:$16 sps:$4 sm:$0xff]  }
 0x74c   : > { %2813 = vmatprep.mubr.bf16.mxu0 %v4525_v48  ;;  %2782 = vmatpush1.bf16.msra.mxu0 %v4035_v1  ;;  %v5205_v40 = vld [vmem:[%s4869_s19 + $0x58] sm:$0xff]  }
 0x74d   : > { %2783 = vmatprep.subr.bf16.mxu0 %v4043_v4  ;;  %2581 = vmatprep.subr.bf16.mxu1 %v4070_v43  ;;  %v2460_v4 = vrot.slane %v2456_v60, %v4923_v6  ;;  %v4096_v43 = vld [vmem:[%s4869_s19 + $0xe0] sm:$0xff]  }
 0x74f   : > { %2582 = vmatpush1.bf16.msra.mxu1 %v4068_v45  ;;  %v5215_v45 = vld [vmem:[%s4869_s19 + $0x60] sm:$0xff]  }
 0x750   : > { %2784 = vmatpush1.bf16.msra.mxu0 %v4041_v8 }
 0x751   : > { %2785 = vmatprep.subr.bf16.mxu0 %v4049_v26 }
 0x754   : > { %2786 = vmatpush1.bf16.msra.mxu0 %v4047_v28  ;;  %v4082_v28 = vld [vmem:[%s4869_s19 + $0x40] sm:$0xff]  }
 0x755   : > { %2787 = vmatprep.subr.bf16.mxu0 %v4055_v29  ;;  %v4085_v29 = vld [vmem:[%s4869_s19 + $0x88] sm:$0xff]  }
 0x758   : > { %2788 = vmatpush1.bf16.msra.mxu0 %v4053_v33  ;;  %v5188_v33 = vld [vmem:[%s4869_s19 + $0x8] sm:$0xff]  }
 0x759   : > { %2789 = vmatprep.subr.bf16.mxu0 %v4061_v35  ;;  %v4089_v35 = vld [vmem:[%s4869_s19 + $0x90] sm:$0xff]  }
 0x75c   : > { %2790 = vmatpush1.bf16.msra.mxu0 %v4059_v37  ;;  %v5198_v37 = vld [vmem:[%s4869_s19 + $0x10] sm:$0xff]  }
 0x75d   : > { %2791 = vmatprep.subr.bf16.mxu0 %v4067_v39  ;;  %v4093_v39 = vld [vmem:[%s4869_s19 + $0x98] sm:$0xff]  }
 0x760   : > { %2792 = vmatpush1.bf16.msra.mxu0 %v4065_v41  ;;  %v5208_v41 = vld [vmem:[%s4869_s19 + $0x18] sm:$0xff]  }
 0x761   : > { %2793 = vmatprep.subr.bf16.mxu0 %v4073_v44  ;;  %v4097_v44 = vld [vmem:[%s4869_s19 + $0xa0] sm:$0xff]  }
 0x81e   : > { %v3850_v49 = vpop.f32.mrb[24].mxu0 }
 0x81f   : > { %v2393_v50 = vpop.f32.mrb[25].mxu0  ;;  %v2402_v53 = vadd.f32 %v3850_v49, %v2309_v46  ;;  %v4076_v49 = vld [vmem:[%s4863_s14 + $0xe4] ss:$16 sps:$4 sm:$0xff]  }
 0x820   : > { %v2394_v51 = vadd.f32 %v2393_v50, %v2309_v46  ;;  %v3851_v52 = vpop.f32.mrb[26].mxu0  ;;  %v4079_v50 = vld [vmem:[%s4863_s14 + $0xec] ss:$16 sps:$4 sm:$0xff]   ;;  %2583 = vmatprep.subr.bf16.mxu1 %v4076_v49 }
 0x821   : > { %v2396_v54 = vpop.f32.mrb[27].mxu0  ;;  %v2405_v62 = vadd.f32 %v3851_v52, %v2309_v46  ;;  %v5109_v61 = vadd.f32 %v4227_v5, %v2402_v53  ;;  %v4077_v52 = vld [vmem:[%s4863_s14 + $0xe8] ss:$16 sps:$4 sm:$0xff]  }
 0x822   : > { %v5101_v55 = vadd.f32 %v4224_v47, %v2394_v51  ;;  %v2397_v56 = vadd.f32 %v2396_v54, %v2309_v46  ;;  %v4071_v46 = vld [vmem:[%s4863_s14 + $0xc8] ss:$16 sps:$4 sm:$0xff]   ;;  %v4074_v51 = vld [vmem:[%s4863_s14 + $0xe0] ss:$16 sps:$4 sm:$0xff]  }
 0x823   : > { %v5106_v59 = vadd.f32 %v4226_v58, %v2405_v62  ;;  %2794 = vmatpush1.bf16.msra.mxu0 %v4071_v46  ;;  %2584 = vmatpush1.bf16.msra.mxu1 %v4074_v51  ;;  %v5218_v46 = vld [vmem:[%s4869_s19 + $0x20] sm:$0xff]   ;;  %v4100_v49 = vld [vmem:[%s4869_s19 + $0xe8] sm:$0xff]  }
 0x824   : > { %v5103_v30 = vadd.f32 %v4225_v57, %v2397_v56  ;;  %2412 = vadd.xlane.f32.xlu1 %v5101_v55  ;;  %2795 = vmatprep.subr.bf16.mxu0 %v4079_v50  ;;  %v4101_v50 = vld [vmem:[%s4869_s19 + $0xa8] sm:$0xff]  }
 0x825   : > { %v5225_v51 = vld [vmem:[%s4869_s19 + $0x68] sm:$0xff]  }
 0x826   : > { %2414 = vadd.xlane.f32.xlu0 %v5103_v30 }
 0x827   : > { %2796 = vmatpush1.bf16.msra.mxu0 %v4077_v52  ;;  %v5228_v52 = vld [vmem:[%s4869_s19 + $0x28] sm:$0xff]  }
 0x828   : > { %2418 = vadd.xlane.f32.xlu1 %v5106_v59  ;;  %3704 = vmatprep.subr.bf16.mxu0 %v4082_v28 }
 0x82a   : > { %2416 = vadd.xlane.f32.xlu0 %v5109_v61 }
 0x8b1   : > { %v2413_v10 = vpop.xlane.xlu1 %2412 }
 0x8b2   : > { %v2420_v9 = vmul.f32 0.0078125, %v2413_v10 }
 0x8b3   : > { %v2415_v42 = vpop.xlane.xlu0 %2414 }
 0x8b4   : > { %v5122_v11 = vsub.f32 %v5101_v55, %v2420_v9  ;;  %v2421_v12 = vmul.f32 0.0078125, %v2415_v42 }
 0x8b5   : > { %v2419_v13 = vpop.xlane.xlu1 %2418 }
 0x8b6   : > { %v5125_v14 = vsub.f32 %v5103_v30, %v2421_v12  ;;  %v2423_v15 = vmul.f32 0.0078125, %v2419_v13  ;;  %v2428_v16 = vmul.f32 %v5122_v11, %v5122_v11  ;;  %v2470_v13 = vrot.slane %v2466_v7, %v4923_v6 }
 0x8b7   : > { %v2417_v17 = vpop.xlane.xlu0 %2416 }
 0x8b8   : > { %v5130_v18 = vsub.f32 %v5106_v59, %v2423_v15  ;;  %v2422_v19 = vmul.f32 0.0078125, %v2417_v17  ;;  %2432 = vadd.xlane.f32.xlu0 %v2428_v16  ;;  %v2429_v20 = vmul.f32 %v5125_v14, %v5125_v14 }
 0x8ba   : > { %v5135_v21 = vsub.f32 %v5109_v61, %v2422_v19  ;;  %2434 = vadd.xlane.f32.xlu1 %v2429_v20  ;;  %v2431_v24 = vmul.f32 %v5130_v18, %v5130_v18 }
 0x8bc   : > { %v2430_v23 = vmul.f32 %v5135_v21, %v5135_v21 }
 0x8be   : > { %2436 = vadd.xlane.f32.xlu0 %v2430_v23  ;;  %2438 = vadd.xlane.f32.xlu1 %v2431_v24 }
 0x945   : > { %v2433_v54 = vpop.xlane.xlu0 %2432 }
 0x946   : > { %v2440_v47 = vmul.f32 0.0078125, %v2433_v54  ;;  %v4104_v54 = vld [vmem:[%s4869_s19 + $0xf0] sm:$0xff]  }
 0x947   : > { %v2435_v62 = vpop.xlane.xlu1 %2434 }
 0x948   : > { %v2444_v56 = vadd.f32 1e-05, %v2440_v47  ;;  %v2441_v53 = vmul.f32 0.0078125, %v2435_v62  ;;  %v4105_v47 = vld [vmem:[%s4869_s19 + $0xb0] sm:$0xff]  }
 0x949   : > { %v5235_v62 = vld [vmem:[%s4869_s19 + $0x70] sm:$0xff]  }
 0x94a   : > { %4152 = vrsqrt.f32 %v2444_v56  ;;  %v2445_v57 = vadd.f32 1e-05, %v2441_v53  ;;  %v5238_v56 = vld [vmem:[%s4869_s19 + $0x30] sm:$0xff]   ;;  %v4108_v53 = vld [vmem:[%s4869_s19 + $0xf8] sm:$0xff]  }
 0x94b   : > { %v2437_v58 = vpop.xlane.xlu0 %2436  ;;  %v2439_v5 = vpop.xlane.xlu1 %2438 }
 0x94c   : > { %4154 = vrsqrt.f32 %v2445_v57  ;;  %v2442_v63 = vmul.f32 0.0078125, %v2437_v58  ;;  %v2443_v0 = vmul.f32 0.0078125, %v2439_v5  ;;  %v4109_v57 = vld [vmem:[%s4869_s19 + $0xb8] sm:$0xff]  }
 0x94d   : > { %v5245_v58 = vld [vmem:[%s4869_s19 + $0x78] sm:$0xff]  }
 0x94e   : > { %v2446_v1 = vadd.f32 1e-05, %v2442_v63  ;;  %v2447_v2 = vadd.f32 1e-05, %v2443_v0  ;;  %v5248_v5 = vld [vmem:[%s4869_s19 + $0x38] sm:$0xff]   ;;  %v4228_v63 = vld [vmem:[%s4871_s30] sm:$0xff] }
 0x94f   : > { %v2478_v0 = vrot.slane %v4228_v63, 4 }
 0x950   : > { %4156 = vrsqrt.f32 %v2446_v1  ;;  %v2690_v1 = vrot.slane %v4228_v63, 6 }
 0x951   : > { %4158 = vrsqrt.f32 %v2447_v2  ;;  %v2482_v2 = vrot.slane %v2478_v0, %v4923_v6 }
 0x952   : > { %v5255_v60 = vrot.slane %v2690_v1, %v4923_v6  ;;  %v5261_v7 = vrot.slane %v2690_v1, %v4933_v22 }
 0x954   : > { %v4153_v8 = vpop.eup %4152 }
 0x955   : > { %v2452_v10 = vmul.f32 %v4153_v8, %v5122_v11 }
 0x956   : > { %v4155_v9 = vpop.eup %4154 }
 0x957   : > { %v2453_v42 = vmul.f32 %v4155_v9, %v5125_v14  ;;  %v2462_v12 = vmul.f32 %v2460_v4, %v2452_v10 }
 0x959   : > { %v2463_v15 = vmul.f32 %v2460_v4, %v2453_v42  ;;  %v2472_v19 = vadd.f32 %v2470_v13, %v2462_v12 }
 0x95a   : > { %v4157_v16 = vpop.eup %4156 }
 0x95b   : > { %v4159_v17 = vpop.eup %4158  ;;  %v2473_v20 = vadd.f32 %v2470_v13, %v2463_v15  ;;  %v2454_v23 = vmul.f32 %v4157_v16, %v5135_v21 }
 0x95c   : > { %v2455_v3 = vmul.f32 %v4159_v17, %v5130_v18  ;;  %v4080_v18 = vld [vmem:[%s4869_s19 + $0xc0] sm:$0xff]  }
 0x95d   : > { %v2476_v24 = vpack.c.bf16 %v2473_v20, %v2472_v19  ;;  %v2464_v11 = vmul.f32 %v2460_v4, %v2454_v23  ;;  %3676 = vmatprep.subr.bf16.mxu1 %v4080_v18 }
 0x95e   : > { %v2465_v25 = vmul.f32 %v2460_v4, %v2455_v3  ;;  %v5258_v4 = vrot.slane %v2478_v0, %v4933_v22 }
 0x95f   : > { %2602 = vmatmul.mubr.bf16.vlgmr.msra.gmra.mrb[24].mxu1 %v2476_v24  ;;  %2814 = vmatmul.mubr.bf16.vlgmr.msra.gmra.mrb[28].mxu0 %v2476_v24  ;;  %v2474_v14 = vadd.f32 %v2470_v13, %v2464_v11 }
 0x960   : > { %2611 = vmatprep.mubr.bf16.mxu1 %v4525_v48  ;;  %2823 = vmatprep.mubr.bf16.mxu0 %v4525_v48  ;;  %v2475_v26 = vadd.f32 %v2470_v13, %v2465_v25  ;;  %v4084_v48 = vld [vmem:[%s4869_s19 + $0xc8] sm:$0xff]  }
 0x961   : > { %3677 = vmatpush3.bf16.msra.mxu1 %v4081_v27  ;;  %3705 = vmatpush3.bf16.msra.mxu0 %v5179_v31 }
 0x962   : > { %v2477_v21 = vpack.c.bf16 %v2475_v26, %v2474_v14  ;;  %3678 = vmatprep.subr.bf16.mxu1 %v4084_v48  ;;  %3706 = vmatprep.subr.bf16.mxu0 %v5185_v32 }
 0x965   : > { %3679 = vmatpush3.bf16.msra.mxu1 %v4085_v29  ;;  %3707 = vmatpush3.bf16.msra.mxu0 %v5188_v33 }
 0x966   : > { %3680 = vmatprep.subr.bf16.mxu1 %v4088_v34  ;;  %3708 = vmatprep.subr.bf16.mxu0 %v5195_v36 }
 0x967   : > { %2612 = vmatmul.mubr.bf16.gmra.mrb[28].mxu1 %v2477_v21  ;;  %2824 = vmatmul.mubr.bf16.gmra.mrb[32].mxu0 %v2477_v21 }
 0x969   : > { %3681 = vmatpush3.bf16.msra.mxu1 %v4089_v35  ;;  %3709 = vmatpush3.bf16.msra.mxu0 %v5198_v37 }
 0x96a   : > { %3682 = vmatprep.subr.bf16.mxu1 %v4092_v38  ;;  %3710 = vmatprep.subr.bf16.mxu0 %v5205_v40 }
 0x96d   : > { %3683 = vmatpush3.bf16.msra.mxu1 %v4093_v39  ;;  %3711 = vmatpush3.bf16.msra.mxu0 %v5208_v41 }
 0x96e   : > { %3684 = vmatprep.subr.bf16.mxu1 %v4096_v43  ;;  %3712 = vmatprep.subr.bf16.mxu0 %v5215_v45 }
 0x971   : > { %3685 = vmatpush3.bf16.msra.mxu1 %v4097_v44  ;;  %3713 = vmatpush3.bf16.msra.mxu0 %v5218_v46 }
 0x972   : > { %3686 = vmatprep.subr.bf16.mxu1 %v4100_v49  ;;  %3714 = vmatprep.subr.bf16.mxu0 %v5225_v51 }
 0x975   : > { %3687 = vmatpush3.bf16.msra.mxu1 %v4101_v50  ;;  %3715 = vmatpush3.bf16.msra.mxu0 %v5228_v52 }
 0x976   : > { %3688 = vmatprep.subr.bf16.mxu1 %v4104_v54  ;;  %3716 = vmatprep.subr.bf16.mxu0 %v5235_v62 }
 0x979   : > { %3689 = vmatpush3.bf16.msra.mxu1 %v4105_v47  ;;  %3717 = vmatpush3.bf16.msra.mxu0 %v5238_v56 }
 0x97a   : > { %3690 = vmatprep.subr.bf16.mxu1 %v4108_v53  ;;  %3718 = vmatprep.subr.bf16.mxu0 %v5245_v58 }
 0x97d   : > { %3691 = vmatpush3.bf16.msra.mxu1 %v4109_v57  ;;  %3719 = vmatpush3.bf16.msra.mxu0 %v5248_v5 }
 0x97e   : > { %3852 = vmatprep.subr.bf16.mxu1 %v4082_v28 }
 0xa32   : > { %v2603_v8 = vpop.f32.mrb[24].mxu1  ;;  %v2815_v10 = vpop.f32.mrb[28].mxu0 }
 0xa33   : > { %v5263_v9 = vadd.f32 %v2603_v8, %v2482_v2  ;;  %v5266_v42 = vadd.f32 %v2815_v10, %v5255_v60  ;;  %v2605_v12 = vpop.f32.mrb[25].mxu1  ;;  %v2817_v13 = vpop.f32.mrb[29].mxu0 }
 0xa34   : > { %v5269_v15 = vadd.f32 %v2605_v12, %v5258_v4  ;;  %v5272_v16 = vadd.f32 %v2817_v13, %v5261_v7  ;;  %v2607_v17 = vpop.f32.mrb[26].mxu1  ;;  %v2819_v19 = vpop.f32.mrb[30].mxu0 }
 0xa35   : > { %v3549_v22 = vmul.f32 -1.702, %v5263_v9  ;;  %v3573_v20 = vmul.f32 -1.702, %v5266_v42  ;;  %v5276_v23 = vadd.f32 %v2607_v17, %v2482_v2  ;;  %v5279_v3 = vadd.f32 %v2819_v19, %v5255_v60  ;;  %v2609_v24 = vpop.f32.mrb[27].mxu1  ;;  %v2821_v11 = vpop.f32.mrb[31].mxu0 }
 0xa36   : > { %v3550_v25 = vmul.f32 -1.702, %v5269_v15  ;;  %v3574_v14 = vmul.f32 -1.702, %v5272_v16  ;;  %v5284_v26 = vadd.f32 %v2609_v24, %v5258_v4  ;;  %v5287_v21 = vadd.f32 %v2821_v11, %v5261_v7 }
 0xa37   : > { %v2638_v18 = vmul.f32 1.442695, %v3549_v22  ;;  %v2850_v27 = vmul.f32 1.442695, %v3573_v20  ;;  %v3551_v28 = vmul.f32 -1.702, %v5276_v23 }
 0xa38   : > { %v2640_v48 = vmul.f32 1.442695, %v3550_v25  ;;  %v2852_v29 = vmul.f32 1.442695, %v3574_v14  ;;  %v3575_v34 = vmul.f32 -1.702, %v5279_v3 }
 0xa39   : > { %4160 = vpow2.f32 %v2638_v18  ;;  %v2642_v35 = vmul.f32 1.442695, %v3551_v28  ;;  %v3552_v38 = vmul.f32 -1.702, %v5284_v26  ;;  %v3576_v39 = vmul.f32 -1.702, %v5287_v21 }
 0xa3a   : > { %4162 = vpow2.f32 %v2850_v27  ;;  %v2854_v43 = vmul.f32 1.442695, %v3575_v34  ;;  %v2613_v44 = vpop.f32.mrb[28].mxu1  ;;  %v2825_v49 = vpop.f32.mrb[32].mxu0 }
 0xa3b   : > { %4164 = vpow2.f32 %v2640_v48  ;;  %v2644_v50 = vmul.f32 1.442695, %v3552_v38  ;;  %v5293_v54 = vadd.f32 %v2613_v44, %v2482_v2  ;;  %v2615_v47 = vpop.f32.mrb[29].mxu1  ;;  %v2827_v53 = vpop.f32.mrb[33].mxu0  ;;  %v2856_v57 = vmul.f32 1.442695, %v3576_v39 }
 0xa3c   : > { %4166 = vpow2.f32 %v2852_v29  ;;  %v5296_v63 = vadd.f32 %v2825_v49, %v5255_v60  ;;  %v5299_v0 = vadd.f32 %v2615_v47, %v5258_v4  ;;  %v2617_v1 = vpop.f32.mrb[30].mxu1  ;;  %v2829_v8 = vpop.f32.mrb[34].mxu0  ;;  %v5308_v18 = vadd.f32 %v2827_v53, %v5261_v7 }
 0xa3d   : > { %4168 = vpow2.f32 %v2642_v35  ;;  %v3553_v10 = vmul.f32 -1.702, %v5293_v54  ;;  %v5302_v12 = vadd.f32 %v2617_v1, %v2482_v2  ;;  %v2619_v13 = vpop.f32.mrb[31].mxu1  ;;  %v2831_v17 = vpop.f32.mrb[35].mxu0  ;;  %v5312_v44 = vadd.f32 %v2829_v8, %v5255_v60 }
 0xa3e   : > { %4170 = vpow2.f32 %v2854_v43  ;;  %v3577_v19 = vmul.f32 -1.702, %v5296_v63  ;;  %v3554_v22 = vmul.f32 -1.702, %v5299_v0  ;;  %v3578_v38 = vmul.f32 -1.702, %v5308_v18 }
 0xa3f   : > { %4172 = vpow2.f32 %v2644_v50  ;;  %v2646_v20 = vmul.f32 1.442695, %v3553_v10  ;;  %v3555_v24 = vmul.f32 -1.702, %v5302_v12  ;;  %v5315_v47 = vadd.f32 %v2619_v13, %v5258_v4 }
 0xa40   : > { %4174 = vpow2.f32 %v2856_v57  ;;  %v2858_v11 = vmul.f32 1.442695, %v3577_v19  ;;  %v2648_v25 = vmul.f32 1.442695, %v3554_v22  ;;  %v5318_v1 = vadd.f32 %v2831_v17, %v5261_v7 }
 0xa41   : > { %4176 = vpow2.f32 %v2646_v20  ;;  %v2650_v14 = vmul.f32 1.442695, %v3555_v24  ;;  %v2860_v22 = vmul.f32 1.442695, %v3578_v38  ;;  %v3579_v8 = vmul.f32 -1.702, %v5312_v44 }
 0xa42   : > { %4178 = vpow2.f32 %v2858_v11  ;;  %v3556_v4 = vmul.f32 -1.702, %v5315_v47  ;;  %v3580_v11 = vmul.f32 -1.702, %v5318_v1 }
 0xa43   : > { %v4161_v2 = vpop.eup %4160  ;;  %4180 = vpow2.f32 %v2648_v25  ;;  %v2862_v17 = vmul.f32 1.442695, %v3579_v8 }
 0xa44   : > { %v4163_v27 = vpop.eup %4162  ;;  %v2654_v28 = vadd.f32 1.0, %v4161_v2  ;;  %4182 = vpow2.f32 %v2650_v14 }
 0xa45   : > { %v4165_v48 = vpop.eup %4164  ;;  %v2866_v29 = vadd.f32 1.0, %v4163_v27  ;;  %v2652_v27 = vmul.f32 1.442695, %v3556_v4 }
 0xa46   : > { %v4167_v34 = vpop.eup %4166  ;;  %4184 = vrcp.f32 %v2654_v28  ;;  %v2655_v35 = vadd.f32 1.0, %v4165_v48  ;;  %v2864_v48 = vmul.f32 1.442695, %v3580_v11 }
 0xa47   : > { %v4169_v39 = vpop.eup %4168  ;;  %4186 = vrcp.f32 %v2866_v29  ;;  %v2867_v43 = vadd.f32 1.0, %v4167_v34 }
 0xa48   : > { %v4171_v49 = vpop.eup %4170  ;;  %4188 = vrcp.f32 %v2655_v35  ;;  %v2656_v50 = vadd.f32 1.0, %v4169_v39 }
 0xa49   : > { %v4173_v53 = vpop.eup %4172  ;;  %4190 = vrcp.f32 %v2867_v43  ;;  %v2868_v57 = vadd.f32 1.0, %v4171_v49 }
 0xa4a   : > { %v4175_v10 = vpop.eup %4174  ;;  %4192 = vrcp.f32 %v2656_v50  ;;  %v2657_v19 = vadd.f32 1.0, %v4173_v53 }
 0xa4b   : > { %v4177_v20 = vpop.eup %4176  ;;  %4194 = vrcp.f32 %v2868_v57  ;;  %v2869_v60 = vadd.f32 1.0, %v4175_v10 }
 0xa4c   : > { %4196 = vrcp.f32 %v2657_v19  ;;  %v2658_v24 = vadd.f32 1.0, %v4177_v20  ;;  %v4179_v13 = vpop.eup %4178 }
 0xa4d   : > { %4198 = vrcp.f32 %v2869_v60  ;;  %v4181_v25 = vpop.eup %4180 }
 0xa4e   : > { %4200 = vpow2.f32 %v2860_v22  ;;  %v4183_v7 = vpop.eup %4182  ;;  %v2659_v11 = vadd.f32 1.0, %v4181_v25 }
 0xa4f   : > { %4202 = vrcp.f32 %v2658_v24  ;;  %v2660_v2 = vadd.f32 1.0, %v4183_v7  ;;  %v2870_v24 = vadd.f32 1.0, %v4179_v13 }
 0xa50   : > { %v4185_v14 = vpop.eup %4184 }
 0xa51   : > { %v4187_v28 = vpop.eup %4186  ;;  %4204 = vrcp.f32 %v2660_v2  ;;  %v2678_v39 = vmul.f32 %v4185_v14, %v5263_v9 }
 0xa52   : > { %v4189_v29 = vpop.eup %4188  ;;  %4206 = vpow2.f32 %v2862_v17  ;;  %v2890_v50 = vmul.f32 %v4187_v28, %v5266_v42 }
 0xa53   : > { %v4191_v34 = vpop.eup %4190  ;;  %4208 = vpow2.f32 %v2652_v27  ;;  %v2679_v10 = vmul.f32 %v4189_v29, %v5269_v15 }
 0xa54   : > { %v4193_v35 = vpop.eup %4192  ;;  %4210 = vpow2.f32 %v2864_v48  ;;  %v2891_v60 = vmul.f32 %v4191_v34, %v5272_v16 }
 0xa55   : > { %v4195_v38 = vpop.eup %4194  ;;  %v2680_v43 = vmul.f32 %v4193_v35, %v5276_v23  ;;  %4212 = vrcp.f32 %v2870_v24 }
 0xa56   : > { %v4197_v49 = vpop.eup %4196  ;;  %v2892_v53 = vmul.f32 %v4195_v38, %v5279_v3  ;;  %4214 = vrcp.f32 %v2659_v11 }
 0xa57   : > { %v4199_v57 = vpop.eup %4198  ;;  %v2686_v19 = vpack.c.bf16 %v2680_v43, %v2678_v39  ;;  %v2681_v22 = vmul.f32 %v4197_v49, %v5284_v26 }
 0xa58   : > { %v4201_v20 = vpop.eup %4200  ;;  %v2898_v8 = vpack.c.bf16 %v2892_v53, %v2890_v50  ;;  %v2893_v9 = vmul.f32 %v4199_v57, %v5287_v21 }
 0xa59   : > { %v2687_v23 = vpack.c.bf16 %v2681_v22, %v2679_v10  ;;  %v4203_v4 = vpop.eup %4202  ;;  %v2871_v42 = vadd.f32 1.0, %v4201_v20 }
 0xa5a   : > { %v2899_v7 = vpack.c.bf16 %v2893_v9, %v2891_v60  ;;  %v2682_v17 = vmul.f32 %v4203_v4, %v5293_v54 }
 0xa5b   : > { %3175 = vmatprep.mubr.bf16.mxu0 %v2687_v23  ;;  %v4205_v3 = vpop.eup %4204  ;;  %4216 = vrcp.f32 %v2871_v42 }
 0xa5c   : > { %3030 = vmatprep.mubr.bf16.mxu1 %v2899_v7  ;;  %3176 = vmatmul.mubr.bf16.vlgmr.msra.gmra.mrb[36].mxu0 %v2686_v19  ;;  %v4207_v15 = vpop.eup %4206  ;;  %v2684_v26 = vmul.f32 %v4205_v3, %v5302_v12 }
 0xa5d   : > { %3031 = vmatmul.mubr.bf16.vlgmr.msra.gmra.mrb[32].mxu1 %v2898_v8  ;;  %v4209_v16 = vpop.eup %4208  ;;  %v2872_v21 = vadd.f32 1.0, %v4207_v15 }
 0xa5e   : > { %3860 = vmatpush3.bf16.msra.mxu1 %v5179_v31  ;;  %v4211_v13 = vpop.eup %4210  ;;  %v2688_v25 = vpack.c.bf16 %v2684_v26, %v2682_v17  ;;  %v2661_v14 = vadd.f32 1.0, %v4209_v16 }
 0xa5f   : > { %3853 = vmatprep.subr.bf16.mxu1 %v5185_v32  ;;  %4218 = vrcp.f32 %v2872_v21  ;;  %v2873_v2 = vadd.f32 1.0, %v4211_v13  ;;  %v4213_v54 = vpop.eup %4212 }
 0xa60   : > { %4220 = vrcp.f32 %v2661_v14  ;;  %v4215_v31 = vpop.eup %4214  ;;  %v2894_v32 = vmul.f32 %v4213_v54, %v5296_v63 }
 0xa61   : > { %4222 = vrcp.f32 %v2873_v2 }
 0xa62   : > { %3861 = vmatpush3.bf16.msra.mxu1 %v5188_v33 }
 0xa63   : > { %3854 = vmatprep.subr.bf16.mxu1 %v5195_v36  ;;  %v2683_v36 = vmul.f32 %v4215_v31, %v5299_v0 }
 0xa65   : > { %v4217_v12 = vpop.eup %4216 }
 0xa66   : > { %3862 = vmatpush3.bf16.msra.mxu1 %v5198_v37  ;;  %v2895_v29 = vmul.f32 %v4217_v12, %v5308_v18 }
 0xa67   : > { %3855 = vmatprep.subr.bf16.mxu1 %v5205_v40 }
 0xa69   : > { %v4219_v27 = vpop.eup %4218 }
 0xa6a   : > { %3863 = vmatpush3.bf16.msra.mxu1 %v5208_v41  ;;  %v4221_v28 = vpop.eup %4220  ;;  %v2896_v48 = vmul.f32 %v4219_v27, %v5312_v44 }
 0xa6b   : > { %3856 = vmatprep.subr.bf16.mxu1 %v5215_v45  ;;  %v4223_v33 = vpop.eup %4222  ;;  %v2685_v37 = vmul.f32 %v4221_v28, %v5315_v47  ;;  %v4229_v47 = vld [vmem:[%s4871_s30 + $0x8] sm:$0x1f] }
 0xa6c   : > { %v2897_v40 = vmul.f32 %v4223_v33, %v5318_v1  ;;  %v2900_v34 = vpack.c.bf16 %v2896_v48, %v2894_v32  ;;  %v3195_v1 = vrot.slane %v4229_v47, %v4923_v6 }
 0xa6d   : > { %v2689_v35 = vpack.c.bf16 %v2685_v37, %v2683_v36 }
 0xa6e   : > { %3864 = vmatpush3.bf16.msra.mxu1 %v5218_v46  ;;  %v2901_v41 = vpack.c.bf16 %v2897_v40, %v2895_v29 }
 0xa6f   : > { %3857 = vmatprep.subr.bf16.mxu1 %v5225_v51 }
 0xa70   : > { %3038 = vmatprep.mubr.bf16.mxu1 %v2901_v41 }
 0xa71   : > { %3039 = vmatmul.mubr.bf16.gmra.mrb[36].mxu1 %v2900_v34 }
 0xa72   : > { %3183 = vmatprep.mubr.bf16.mxu1 %v2689_v35  ;;  %3865 = vmatpush3.bf16.msra.mxu1 %v5228_v52 }
 0xa73   : > { %3858 = vmatprep.subr.bf16.mxu1 %v5235_v62 }
 0xa76   : > { %3866 = vmatpush3.bf16.msra.mxu1 %v5238_v56 }
 0xa77   : > { %3859 = vmatprep.subr.bf16.mxu1 %v5245_v58 }
 0xa7a   : > { %3867 = vmatpush3.bf16.msra.mxu1 %v5248_v5 }
 0xa7d   : > { %3184 = vmatmul.mubr.bf16.vlgmr.msra.gmra.mrb[40].mxu1 %v2688_v25 }
 0xb2f   : > { %v3720_v45 = vpop.f32.mrb[36].mxu0 }
 0xb30   : > { %v3692_v46 = vpop.f32.mrb[32].mxu1  ;;  %v3721_v63 = vpop.f32.mrb[37].mxu0 }
 0xb31   : > { %v3693_v0 = vpop.f32.mrb[33].mxu1  ;;  %v3722_v51 = vadd.f32 %v3721_v63, %v3720_v45  ;;  %v3723_v18 = vpop.f32.mrb[38].mxu0 }
 0xb32   : > { %v3694_v44 = vadd.f32 %v3693_v0, %v3692_v46  ;;  %v3695_v52 = vpop.f32.mrb[34].mxu1  ;;  %v3724_v38 = vpop.f32.mrb[39].mxu0 }
 0xb33   : > { %v3696_v62 = vpop.f32.mrb[35].mxu1  ;;  %v3725_v39 = vadd.f32 %v3724_v38, %v3723_v18 }
 0xb34   : > { %v3178_v56 = vadd.f32 %v3722_v51, %v3694_v44  ;;  %v3697_v43 = vadd.f32 %v3696_v62, %v3695_v52 }
 0xb36   : > { %v3197_v58 = vadd.f32 %v3195_v1, %v3178_v56  ;;  %v3181_v49 = vadd.f32 %v3725_v39, %v3697_v43 }
 0xb38   : > { %v3201_v5 = vadd.f32 %v3197_v58, %v5101_v55  ;;  %v3198_v50 = vadd.f32 %v3195_v1, %v3181_v49 }
 0xb3a   : > { %v3202_v53 = vadd.f32 %v3198_v50, %v5103_v30  ;;  %3209 = vst [vmem:[#allocation14] sm:$0xff] (!%p3613_p8), %v3201_v5 }
 0xb3c   : > { %3210 = vst [vmem:[#allocation14 + $0x8] sm:$0xff] (!%p3613_p8), %v3202_v53 }
 0xb44   : > { %v3698_v57 = vpop.f32.mrb[36].mxu1 }
 0xb45   : > { %v3699_v10 = vpop.f32.mrb[37].mxu1 }
 0xb46   : > { %v3700_v19 = vadd.f32 %v3699_v10, %v3698_v57  ;;  %v3701_v22 = vpop.f32.mrb[38].mxu1 }
 0xb47   : > { %v3702_v20 = vpop.f32.mrb[39].mxu1 }
 0xb48   : > { %v3703_v60 = vadd.f32 %v3702_v20, %v3701_v22 }
 0xb50   : > { %v3726_v6 = vpop.f32.mrb[40].mxu1 }
 0xb51   : > { %v3727_v8 = vpop.f32.mrb[41].mxu1 }
 0xb52   : > { %v3728_v9 = vadd.f32 %v3727_v8, %v3726_v6  ;;  %v3729_v24 = vpop.f32.mrb[42].mxu1 }
 0xb53   : > { %v3730_v23 = vpop.f32.mrb[43].mxu1 }
 0xb54   : > { %v3186_v4 = vadd.f32 %v3728_v9, %v3700_v19  ;;  %v3731_v11 = vadd.f32 %v3730_v23, %v3729_v24  ;;  %3208 = sbr.rel (%p3613_p8) target bundleno = 2909 (0xb5d), region = 80 }
 0xb56   : > { %v3199_v7 = vadd.f32 %v3195_v1, %v3186_v4  ;;  %v3189_v42 = vadd.f32 %v3731_v11, %v3703_v60 }
 0xb58   : > { %v3203_v55 = vadd.f32 %v3199_v7, %v5109_v61  ;;  %v3200_v3 = vadd.f32 %v3195_v1, %v3189_v42 }
 0xb5a   : > { %v3204_v30 = vadd.f32 %v3200_v3, %v5106_v59  ;;  %3211 = vst [vmem:[#allocation14 + $0x10] sm:$0xff] (!%p3613_p8), %v3203_v55 }
 0xb5c   : > { %3212 = vst [vmem:[#allocation14 + $0x18] sm:$0xff] %v3204_v30 }
 0xb5d PF: > { %p3614_p3 = scmp.ne.s32.totalorder %s4500_s27, 1 }
 0xb5e   : > { %3219 = vadd.xlane.f32.xlu0 (!%p3614_p3), %v3201_v5  ;;  %3223 = vadd.xlane.f32.xlu1 (!%p3614_p3), %v3203_v55  ;;  %s5454_s20 = sld [smem:[#allocation26_spill]] (!%p3614_p3) }
 0xb5f   : > { %3216 = sbr.rel (%p3614_p3) target bundleno = 3230 (0xc9e), region = 84 }
 0xb62   : > { %3221 = vadd.xlane.f32.xlu0 (!%p3614_p3), %v3202_v53  ;;  %3225 = vadd.xlane.f32.xlu1 (!%p3614_p3), %v3204_v30 }
 0xb64   : > { %v3615_v0 = vld [vmem:[%s5454_s20] ss:$0 sm:$0xff] (!%p3614_p3)  ;;  %v3616_v18 = vld [vmem:[%s5454_s20 + $0x1] ss:$0 sm:$0xff] (!%p3614_p3) }
 0xbeb   : > { %v3220_v15 = vpop.xlane.xlu0 %3219  ;;  %v3224_v61 = vpop.xlane.xlu1 %3223 }
 0xbec   : > { %v3227_v17 = vmul.f32 0.0078125, %v3220_v15  ;;  %v3229_v26 = vmul.f32 0.0078125, %v3224_v61 }
 0xbee   : > { %v3231_v59 = vsub.f32 %v3201_v5, %v3227_v17  ;;  %v3233_v16 = vsub.f32 %v3203_v55, %v3229_v26 }
 0xbef   : > { %v3222_v21 = vpop.xlane.xlu0 %3221  ;;  %v3226_v13 = vpop.xlane.xlu1 %3225 }
 0xbf0   : > { %v3228_v25 = vmul.f32 0.0078125, %v3222_v21  ;;  %v3235_v14 = vmul.f32 %v3231_v59, %v3231_v59  ;;  %v3230_v2 = vmul.f32 0.0078125, %v3226_v13  ;;  %v3237_v12 = vmul.f32 %v3233_v16, %v3233_v16 }
 0xbf2   : > { %v3232_v54 = vsub.f32 %v3202_v53, %v3228_v25  ;;  %3239 = vadd.xlane.f32.xlu0 %v3235_v14  ;;  %v3234_v31 = vsub.f32 %v3204_v30, %v3230_v2 }
 0xbf4   : > { %v3236_v27 = vmul.f32 %v3232_v54, %v3232_v54  ;;  %v3238_v28 = vmul.f32 %v3234_v31, %v3234_v31 }
 0xbf6   : > { %3243 = vadd.xlane.f32.xlu0 %v3237_v12  ;;  %3241 = vadd.xlane.f32.xlu1 %v3236_v27 }
 0xbfa   : > { %3245 = vadd.xlane.f32.xlu1 %v3238_v28 }
 0xc7f   : > { %v3240_v32 = vpop.xlane.xlu0 %3239 }
 0xc80   : > { %v3247_v48 = vmul.f32 0.0078125, %v3240_v32 }
 0xc82   : > { %v3251_v33 = vadd.f32 1e-05, %v3247_v48 }
 0xc83   : > { %v3242_v36 = vpop.xlane.xlu1 %3241  ;;  %v3244_v37 = vpop.xlane.xlu0 %3243 }
 0xc84   : > { %4230 = vrsqrt.f32 %v3251_v33  ;;  %v3248_v29 = vmul.f32 0.0078125, %v3242_v36  ;;  %v3249_v40 = vmul.f32 0.0078125, %v3244_v37 }
 0xc86   : > { %v3252_v34 = vadd.f32 1e-05, %v3248_v29  ;;  %v3253_v35 = vadd.f32 1e-05, %v3249_v40 }
 0xc87   : > { %v3246_v41 = vpop.xlane.xlu1 %3245 }
 0xc88   : > { %4232 = vrsqrt.f32 %v3252_v34  ;;  %v3250_v45 = vmul.f32 0.0078125, %v3246_v41 }
 0xc89   : > { %4234 = vrsqrt.f32 %v3253_v35 }
 0xc8a   : > { %v3254_v46 = vadd.f32 1e-05, %v3250_v45 }
 0xc8c   : > { %4236 = vrsqrt.f32 %v3254_v46 }
 0xc8e   : > { %v4231_v63 = vpop.eup %4230 }
 0xc8f   : > { %v3259_v51 = vmul.f32 %v4231_v63, %v3231_v59 }
 0xc91   : > { %v3267_v44 = vmul.f32 %v3615_v0, %v3259_v51 }
 0xc92   : > { %v4233_v47 = vpop.eup %4232 }
 0xc93   : > { %v4235_v1 = vpop.eup %4234  ;;  %v3275_v52 = vadd.f32 %v3616_v18, %v3267_v44  ;;  %v3260_v38 = vmul.f32 %v4233_v47, %v3232_v54 }
 0xc94   : > { %v3261_v62 = vmul.f32 %v4235_v1, %v3233_v16 }
 0xc95   : > { %3279 = vst [vmem:[#allocation14] sm:$0xff] %v3275_v52  ;;  %v3268_v39 = vmul.f32 %v3615_v0, %v3260_v38 }
 0xc96   : > { %v4237_v56 = vpop.eup %4236  ;;  %v3269_v43 = vmul.f32 %v3615_v0, %v3261_v62 }
 0xc97   : > { %v3276_v58 = vadd.f32 %v3616_v18, %v3268_v39  ;;  %v3262_v49 = vmul.f32 %v4237_v56, %v3234_v31 }
 0xc98   : > { %v3277_v5 = vadd.f32 %v3616_v18, %v3269_v43 }
 0xc99   : > { %3280 = vst [vmem:[#allocation14 + $0x8] sm:$0xff] %v3276_v58  ;;  %v3270_v50 = vmul.f32 %v3615_v0, %v3262_v49 }
 0xc9a   : > { %3281 = vst [vmem:[#allocation14 + $0x10] sm:$0xff] %v3277_v5 }
 0xc9b   : > { %v3278_v53 = vadd.f32 %v3616_v18, %v3270_v50 }
 0xc9d   : > { %3282 = vst [vmem:[#allocation14 + $0x18] sm:$0xff] %v3278_v53 }
 0xc9e PF: > { %p3915_p9 = scmp.eq.s32.totalorder %s4715_s22, 1  ;;  %s4529_s11 = smov [#allocation14]  }
 0xc9f   : > { %s3292_s13 = sshll.u32 %s4529_s11, 4  ;;  %s3293_s13 = int_to_ptr.vmem [resolvable:$true] %s3292_s13 }
 0xca0   : > { %s4416_s21 = scalar_lea.vmem %s3293_s13, 512  ;;  %p4423_p12 = scmp.lt.s32.totalorder %s3293_s13, %s3293_s13 }
 0xca1   : > { %p4417_p2 = scmp.ne.s32.totalorder %s3293_s13, %s4416_s21  ;;  %p4424_p5 = scmp.lt.s32.totalorder %s4416_s21, %s4416_s21 }
 0xca3   : > { %p4418_p0 = pnand %p4417_p2, %p3915_p9  ;;  %p4425_p11 = por %p4424_p5, %p4423_p12 }
 0xca5   : > { %p4419_p1 = pneg %p4418_p0 }
 0xca7   : > { %p4426_p4 = pnand %p4425_p11, %p4419_p1 }
 0xca9   : > { %4429 = shalt.err (!%p4426_p4)
}
 0xcaa   : > { %s5455_s8 = sld [smem:[#allocation27_spill]] }
 0xcb0   : > { %s4430_s12 = scalar_lea.hbm %s5455_s8, 512 }
 0xcb1   : > { %p4431_p10 = scmp.ne.s32.totalorder %s5455_s8, %s4430_s12  ;;  %p4436_p7 = scmp.lt.u32.totalorder %s4430_s12, %s5455_s8 }
 0xcb3   : > { %p4432_p13 = pnand %p4431_p10, %p3915_p9 }
 0xcb5   : > { %p4433_p6 = pneg %p4432_p13 }
 0xcb7   : > { %p4438_p8 = pnand %p4436_p7, %p4433_p6 }
 0xcb9   : > { %4441 = shalt.err (!%p4438_p8)
}
 0xcba   : > { %s4530_s24 = smov 128   ;;  %s4531_s17 = smov 8  }
 0xcbb   : > { %3889 = dma.vmem_to_hbm [thread:$0]  (%p3915_p9), %s3293_s13, 512, %s5455_s8, [#allocation5], %s4530_s24, %s4530_s24, %s4531_s17  }
 0xcbc   : > { %4483 = dma.done.wait (%p3915_p9), [#allocation5], 512  }
 0xcbd   : > { %4485 = vsyncadd (%p3915_p9), [#allocation5], 4294966784 }
 0xcbe PF: > { %s5456_s19 = sld [smem:[#allocation21_spill]]  ;;  %s5457_s3 = sld [smem:[#allocation20_spill]] }
 0xcbf   : > { %s5458_s26 = sld [smem:[#allocation23_spill]]  ;;  %s5459_s30 = sld [smem:[#allocation22_spill]] }
 0xcc0   : > { %s5460_s24 = smov %s4492_s25  ;;  %s5462_s27 = smov %s4504_s28 }
 0xcc4   : > { %s28_s29 = sadd.s32 1, %s5456_s19   ;;  %s5461_s25 = smov %s5457_s3 }
 0xcc5   : > { %p25_p3 = scmp.ge.s32.totalorder %s28_s29, 4   ;;  %s5463_s28 = smov %s5459_s30 }
 0xcc7   :  { %27 = sbr.rel (!%p25_p3) target bundleno = 15 (0xf), region = 152 }
 0xcce   :  { %3308 = vsyncpa [#allocation4], 1 }
 0xccf   :  { %3310 = vsyncpa [#allocation4 + $0x1], 1 }
 0xcd0   :  { %3311 = vsyncpa [#allocation7], 1 }
 0xcd1   :  { %3313 = vsyncpa [#allocation7 + $0x1], 1 }
 0xcd2   :  { %3314 = vsyncpa [#allocation10], 1 }
 0xcd3   :  { %3316 = vsyncpa [#allocation10 + $0x1], 1 }
 0xcd4   :  { %3317 = vsyncpa [#allocation13], 1 }
 0xcd5   :  { %3319 = vsyncpa [#allocation13 + $0x1], 1 }
 0xcd6   :  { %3320 = vsyncpa [#allocation5], 1 }
 0xcd7   :  { %3322 = vsyncpa [#allocation5 + $0x1], 1 }

</bundles_post_ra>
